<compile_context>
chip_gen: v6e
topology: v6e:2x2x1
jax: 0.10.0
libtpu: 0.0.40
codegen_flags: <defaults>
</compile_context>

<pallas_src>
import functools

import jax
import jax.numpy as jnp
from jax import lax
from jax.experimental import pallas as pl
from jax.experimental.pallas import tpu as pltpu


# ----------------------------- math helpers ---------------------------------

def _gelu_new(x):
    # GPT-2 "gelu_new" (tanh approximation); constants follow x's dtype so the
    # bf16 EUP path actually stays bf16.
    c = jnp.asarray(0.7978845608028654, dtype=x.dtype)   # sqrt(2/pi)
    a = jnp.asarray(0.044715, dtype=x.dtype)
    return 0.5 * x * (1.0 + jnp.tanh(c * (x + a * x * x * x)))


def _ln(x, g, b, eps=1e-5):
    mu = jnp.mean(x, axis=-1, keepdims=True)
    var = jnp.mean((x - mu) ** 2, axis=-1, keepdims=True)
    return (x - mu) * lax.rsqrt(var + eps) * g + b


def _device_kind():
    try:
        return jax.devices()[0].device_kind.lower()
    except Exception:
        return ""


def _bf16_transcendentals():
    # v6e / v7x have bf16-capable EUP/VPU; v5e (and older) do not.
    kind = _device_kind()
    return ("v6" in kind) or ("v7" in kind)


def _vmem_limit_bytes():
    kind = _device_kind()
    if "v7" in kind:
        return 48 * 1024 * 1024       # leave headroom inside v7x's 64 MiB VMEM
    if "v5" in kind or "v6" in kind:
        return 100 * 1024 * 1024      # 128 MiB physical
    return 64 * 1024 * 1024


# ---------------- fused transformer stack kernel (grid = (B, L)) ------------

def _stack_kernel(x_ref, m_ref,
                  ln1g_r, ln1b_r, wqkv_r, bqkv_r, wo_r, bo_r,
                  ln2g_r, ln2b_r, wfc_r, bfc_r, wp_r, bp_r,
                  o_ref, bias_ref, ctx_ref, *, H, nh, bf16_eup):
    S = x_ref.shape[1]
    hd = H // nh
    l = pl.program_id(1)
    neg = jnp.float32(-1e9)

    # Layer 0: pull residual stream into the resident output block and build
    # the causal + key-padding additive bias ONCE per batch element.
    @pl.when(l == 0)
    def _():
        o_ref[...] = x_ref[...]
        row = lax.broadcasted_iota(jnp.int32, (S, S), 0)
        col = lax.broadcasted_iota(jnp.int32, (S, S), 1)
        mrow = m_ref[0].astype(jnp.float32)                      # (1, S)
        bias_ref[...] = (jnp.where(col <= row, jnp.float32(0.0), neg)
                         + (1.0 - mrow) * neg)

    x = o_ref[0].astype(jnp.float32)                             # (S, H) residual

    ln1g = ln1g_r[0]; ln1b = ln1b_r[0]                           # (1, H)
    ln2g = ln2g_r[0]; ln2b = ln2b_r[0]
    wqkv = wqkv_r[0]                                             # (H, 3H) bf16
    bqkv = bqkv_r[0]                                             # (1, 3H) f32
    wo = wo_r[0]; bo = bo_r[0]                                   # (H, H) / (1, H)
    bp = bp_r[0]                                                 # (1, H)

    # --- attention -----------------------------------------------------------
    h = _ln(x, ln1g, ln1b)
    qkv = jnp.dot(h.astype(jnp.bfloat16), wqkv,
                  preferred_element_type=jnp.float32) + bqkv     # (S, 3H)
    qkv16 = qkv.astype(jnp.bfloat16)

    scale = jnp.float32(1.0 / (hd ** 0.5))
    dims_qkT = (((1,), (1,)), ((), ()))          # contract last dims: q @ k^T
    hg = 2 if (nh % 2 == 0 and hd < 128) else 1  # pair heads -> lane-dense ctx stores
    gw = hg * hd
    TQ = S if S <= 256 else 256                  # query chunk bounds (S,S) f32 temps

    for q0 in range(0, S, TQ):
        tq = min(TQ, S - q0)
        bias_q = bias_ref[q0:q0 + tq, :]                         # (tq, S)
        for g in range(nh // hg):
            parts = []
            for t in range(hg):
                off = (g * hg + t) * hd
                qh = qkv16[q0:q0 + tq, off:off + hd]
                kh = qkv16[:, H + off:H + off + hd]
                vh = qkv16[:, 2 * H + off:2 * H + off + hd]
                s = lax.dot_general(qh, kh, dims_qkT,
                                    preferred_element_type=jnp.float32)
                s = s * scale + bias_q
                s = s - jnp.max(s, axis=-1, keepdims=True)
                p = jnp.exp(s.astype(jnp.bfloat16)) if bf16_eup else jnp.exp(s)
                inv = pl.reciprocal(
                    jnp.sum(p.astype(jnp.float32), axis=-1, keepdims=True),
                    approx=True)
                # normalize AFTER the P@V matmul: (tq,hd) scale, not (tq,S)
                parts.append(jnp.dot(p.astype(jnp.bfloat16), vh,
                                     preferred_element_type=jnp.float32) * inv)
            blk = parts[0] if hg == 1 else jnp.concatenate(parts, axis=-1)
            ctx_ref[q0:q0 + tq, g * gw:(g + 1) * gw] = blk.astype(jnp.bfloat16)

    # ONE full-width (S,H) @ (H,H) output projection
    attn = jnp.dot(ctx_ref[...], wo, preferred_element_type=jnp.float32) + bo
    x = x + attn

    # --- MLP (chunked along the 4H axis) -------------------------------------
    h2 = _ln(x, ln2g, ln2b).astype(jnp.bfloat16)
    FF = wfc_r.shape[-1]
    CH = FF if FF <= 1024 else 1024
    y = x + bp
    for c in range(0, FF, CH):
        w = min(CH, FF - c)
        wfc_c = wfc_r[0, :, c:c + w]                             # (H, w)  bf16
        bfc_c = bfc_r[0, :, c:c + w]                             # (1, w)  f32
        wp_c = wp_r[0, c:c + w, :]                               # (w, H)  bf16
        ffc = jnp.dot(h2, wfc_c, preferred_element_type=jnp.float32) + bfc_c
        ffa = _gelu_new(ffc.astype(jnp.bfloat16)) if bf16_eup else _gelu_new(ffc)
        y = y + jnp.dot(ffa.astype(jnp.bfloat16), wp_c,
                        preferred_element_type=jnp.float32)
    o_ref[0] = y.astype(o_ref.dtype)


def transformer_stack(x, mask3, p, bf16_eup):
    B, S, H = x.shape
    L = p["w_qkv"].shape[0]
    nh = p["nh"]

    def wspec(a):                       # stacked per-layer params: block (1, ...)
        return pl.BlockSpec((1,) + a.shape[1:], lambda b, l: (l, 0, 0))

    weights = [p["ln1_g"], p["ln1_b"], p["w_qkv"], p["b_qkv"], p["w_o"], p["b_o"],
               p["ln2_g"], p["ln2_b"], p["w_fc"], p["b_fc"], p["w_proj"], p["b_proj"]]

    return pl.pallas_call(
        functools.partial(_stack_kernel, H=H, nh=nh, bf16_eup=bf16_eup),
        out_shape=jax.ShapeDtypeStruct((B, S, H), jnp.float32),   # residual pinned f32
        grid=(B, L),
        in_specs=[pl.BlockSpec((1, S, H), lambda b, l: (b, 0, 0)),
                  pl.BlockSpec((1, 1, S), lambda b, l: (b, 0, 0))]
                 + [wspec(a) for a in weights],
        out_specs=pl.BlockSpec((1, S, H), lambda b, l: (b, 0, 0)),
        scratch_shapes=[pltpu.VMEM((S, S), jnp.float32),      # additive bias (per b)
                        pltpu.VMEM((S, H), jnp.bfloat16)],    # attention context
        compiler_params=pltpu.CompilerParams(
            dimension_semantics=("parallel", "arbitrary"),
            vmem_limit_bytes=_vmem_limit_bytes()),
    )(x.astype(jnp.float32), mask3, *weights)


# ------------------ final LayerNorm + position gather + head ----------------

def _head_kernel(x_hbm, pos_ref, g_ref, b_ref, w_ref, hb_ref, o_ref, row_buf, sem):
    bidx = pl.program_id(0)
    nb = pl.num_programs(0)

    def start_row(i, slot):
        pltpu.make_async_copy(x_hbm.at[i, pl.ds(pos_ref[i], 1)],
                              row_buf.at[slot], sem.at[slot]).start()

    @pl.when(bidx == 0)          # prime the pipeline
    def _():
        start_row(0, 0)

    @pl.when(bidx + 1 < nb)      # prefetch next row into the other slot
    def _():
        start_row(bidx + 1, (bidx + 1) % 2)

    slot = bidx % 2
    pltpu.make_async_copy(x_hbm.at[bidx, pl.ds(pos_ref[bidx], 1)],
                          row_buf.at[slot], sem.at[slot]).wait()

    row = row_buf[slot].astype(jnp.float32)               # (1, H)
    hn = _ln(row, g_ref[...], b_ref[...])
    # lane-dense 1-unit head: VPU multiply + lane reduction (no N=1 MXU matmul)
    prod = (hn.astype(jnp.bfloat16) * w_ref[...]).astype(jnp.float32)
    logit = jnp.sum(prod, axis=-1, keepdims=True) + hb_ref[...]
    o_ref[pl.ds(bidx, 1), :] = logit.astype(o_ref.dtype)


def gather_head(x, pos, g, b, w, hb):
    B, S, H = x.shape
    out = pl.pallas_call(
        _head_kernel,
        out_shape=jax.ShapeDtypeStruct((B, 1), jnp.float32),
        grid=(B,),
        in_specs=[pl.BlockSpec(memory_space=pl.ANY),                   # x stays in HBM
                  pl.BlockSpec(memory_space=pltpu.MemorySpace.SMEM),   # pos scalars
                  pl.BlockSpec((1, H), lambda bi: (0, 0)),             # lnf gamma
                  pl.BlockSpec((1, H), lambda bi: (0, 0)),             # lnf beta
                  pl.BlockSpec((1, H), lambda bi: (0, 0)),             # head weight (row)
                  pl.BlockSpec((1, 1), lambda bi: (0, 0))],            # head bias
        out_specs=pl.BlockSpec((B, 1), lambda bi: (0, 0)),
        scratch_shapes=[pltpu.VMEM((2, 1, H), x.dtype),                # double buffer
                        pltpu.SemaphoreType.DMA((2,))],
        compiler_params=pltpu.CompilerParams(dimension_semantics=("arbitrary",)),
    )(x, pos, g, b, w, hb)
    return out[:, 0]


# ------------------------------ parameters ----------------------------------

def init_params(key, V, P, H, nh, L):
    keys = iter(jax.random.split(key, 16))

    def nrm(shape, dtype=jnp.float32, std=0.02):
        return (jax.random.normal(next(keys), shape, jnp.float32) * std).astype(dtype)

    bf = jnp.bfloat16
    return dict(
        nh=nh,
        wte=nrm((V, H)), wpe=nrm((P, H)),
        ln1_g=jnp.ones((L, 1, H), jnp.float32), ln1_b=jnp.zeros((L, 1, H), jnp.float32),
        w_qkv=nrm((L, H, 3 * H), bf), b_qkv=nrm((L, 1, 3 * H)),
        w_o=nrm((L, H, H), bf), b_o=nrm((L, 1, H)),
        ln2_g=jnp.ones((L, 1, H), jnp.float32), ln2_b=jnp.zeros((L, 1, H), jnp.float32),
        w_fc=nrm((L, H, 4 * H), bf), b_fc=nrm((L, 1, 4 * H)),
        w_proj=nrm((L, 4 * H, H), bf), b_proj=nrm((L, 1, H)),
        lnf_g=jnp.ones((H,), jnp.float32), lnf_b=jnp.zeros((H,), jnp.float32),
        w_head=nrm((H, 1), bf), b_head=nrm((1,)),
    )


# ------------------------------- forward pass --------------------------------

def gpt2_discriminate_forward(params, input_ids, attention_mask, pos, bf16_eup):
    B, S = input_ids.shape
    H = params["wte"].shape[1]
    # token + position embeddings (glue / gather in plain JAX)
    h = params["wte"][input_ids] + params["wpe"][jnp.arange(S)][None, :, :]
    mask3 = attention_mask.astype(jnp.float32).reshape(B, 1, S)
    h = transformer_stack(h, mask3, params, bf16_eup)
    # pos.squeeze().unsqueeze(0) + fancy index  ==  per-example gather at pos[b]
    pos_i = pos.reshape(-1).astype(jnp.int32)
    return gather_head(h, pos_i,
                       params["lnf_g"].reshape(1, H), params["lnf_b"].reshape(1, H),
                       params["w_head"].reshape(1, H), params["b_head"].reshape(1, 1))


# --------------------------- pure-JAX reference -------------------------------

def reference_forward(params, input_ids, attention_mask, pos, bf16_eup):
    B, S = input_ids.shape
    H = params["wte"].shape[1]
    nh = params["nh"]
    hd = H // nh
    L = params["w_qkv"].shape[0]

    def mm(a, w):  # mirror kernel precision policy: bf16 operands, f32 acc
        return jnp.dot(a.astype(jnp.bfloat16), w.astype(jnp.bfloat16),
                       preferred_element_type=jnp.float32)

    h = params["wte"][input_ids] + params["wpe"][jnp.arange(S)][None, :, :]
    neg = jnp.float32(-1e9)
    key_bias = (1.0 - attention_mask.astype(jnp.float32)) * neg           # (B, S)
    causal = jnp.where(jnp.arange(S)[:, None] >= jnp.arange(S)[None, :],
                       jnp.float32(0.0), neg)                             # (S, S)
    bias = causal[None, None, :, :] + key_bias[:, None, None, :]          # (B,1,S,S)
    scale = jnp.float32(1.0 / (hd ** 0.5))

    for l in range(L):
        x = h
        hn = _ln(x, params["ln1_g"][l, 0], params["ln1_b"][l, 0])
        qkv = mm(hn, params["w_qkv"][l]) + params["b_qkv"][l, 0]
        q = qkv[..., :H].reshape(B, S, nh, hd).transpose(0, 2, 1, 3)
        k = qkv[..., H:2 * H].reshape(B, S, nh, hd).transpose(0, 2, 1, 3)
        v = qkv[..., 2 * H:].reshape(B, S, nh, hd).transpose(0, 2, 1, 3)
        s = jnp.einsum("bhqd,bhkd->bhqk", q.astype(jnp.bfloat16),
                       k.astype(jnp.bfloat16),
                       preferred_element_type=jnp.float32)
        s = s * scale + bias
        s = s - jnp.max(s, axis=-1, keepdims=True)
        p = jnp.exp(s.astype(jnp.bfloat16)) if bf16_eup else jnp.exp(s)
        denom = jnp.sum(p.astype(jnp.float32), axis=-1, keepdims=True)
        ctx = jnp.einsum("bhqk,bhkd->bhqd", p.astype(jnp.bfloat16),
                         v.astype(jnp.bfloat16),
                         preferred_element_type=jnp.float32) / denom
        ctx = ctx.transpose(0, 2, 1, 3).reshape(B, S, H)
        x = x + mm(ctx, params["w_o"][l]) + params["b_o"][l, 0]
        hn2 = _ln(x, params["ln2_g"][l, 0], params["ln2_b"][l, 0])
        ff = mm(hn2, params["w_fc"][l]) + params["b_fc"][l, 0]
        ff = _gelu_new(ff.astype(jnp.bfloat16)) if bf16_eup else _gelu_new(ff)
        h = x + mm(ff, params["w_proj"][l]) + params["b_proj"][l, 0]

    hf = _ln(h, params["lnf_g"], params["lnf_b"])
    pos_i = pos.reshape(-1)
    gathered = hf[jnp.arange(B), pos_i]                                   # (B, H)
    return (mm(gathered, params["w_head"]) + params["b_head"])[:, 0]


# ----------------------------------- main ------------------------------------

if __name__ == "__main__":
    B, S, H, NH, L, V, P = 2, 8, 32, 4, 2, 50, 16

    key = jax.random.PRNGKey(0)
    kp, kids = jax.random.split(key, 2)
    params = init_params(kp, V, P, H, NH, L)

    input_ids = jax.random.randint(kids, (B, S), 0, V, dtype=jnp.int32)
    attention_mask = jnp.array([[1] * S, [1] * (S - 2) + [0] * 2], dtype=jnp.int32)
    pos = jnp.array([[S - 1], [S - 3]], dtype=jnp.int32)   # (B, 1), like the torch module

    bf16_eup = _bf16_transcendentals()

    logits = gpt2_discriminate_forward(params, input_ids, attention_mask, pos, bf16_eup)
    jax.block_until_ready(logits)

    ref = reference_forward(params, input_ids, attention_mask, pos, bf16_eup)
    assert logits.shape == (B,)
    assert jnp.allclose(logits, ref, atol=5e-3, rtol=5e-2), (logits, ref)

    print("KERNEL_OK")
</pallas_src>

<mosaic_0001>
module attributes {stable_mosaic.version = 11 : i64} {
  func.func @_stack_kernel(%arg0: i32, %arg1: i32, %arg2: memref<1x8x32xf32, #tpu.memory_space<vmem>>, %arg3: memref<1x1x8xf32, #tpu.memory_space<vmem>>, %arg4: memref<1x1x32xf32, #tpu.memory_space<vmem>>, %arg5: memref<1x1x32xf32, #tpu.memory_space<vmem>>, %arg6: memref<1x32x96xbf16, #tpu.memory_space<vmem>>, %arg7: memref<1x1x96xf32, #tpu.memory_space<vmem>>, %arg8: memref<1x32x32xbf16, #tpu.memory_space<vmem>>, %arg9: memref<1x1x32xf32, #tpu.memory_space<vmem>>, %arg10: memref<1x1x32xf32, #tpu.memory_space<vmem>>, %arg11: memref<1x1x32xf32, #tpu.memory_space<vmem>>, %arg12: memref<1x32x128xbf16, #tpu.memory_space<vmem>>, %arg13: memref<1x1x128xf32, #tpu.memory_space<vmem>>, %arg14: memref<1x128x32xbf16, #tpu.memory_space<vmem>>, %arg15: memref<1x1x32xf32, #tpu.memory_space<vmem>>, %arg16: memref<1x8x32xf32, #tpu.memory_space<vmem>>, %arg17: memref<8x8xf32, #tpu.memory_space<vmem>>, %arg18: memref<8x32xbf16, #tpu.memory_space<vmem>>) attributes {dimension_semantics = [#tpu.dimension_semantics<parallel>, #tpu.dimension_semantics<arbitrary>], iteration_bounds = array<i64: 2, 2>, scalar_prefetch = 0 : i64, scratch_operands = 2 : i64, tpu.core_type = #tpu.core_type<tc>, window_params = [{transform_indices = @transform_0, window_bounds = array<i64: 1, 8, 32>}, {transform_indices = @transform_1, window_bounds = array<i64: 1, 1, 8>}, {transform_indices = @transform_2, window_bounds = array<i64: 1, 1, 32>}, {transform_indices = @transform_3, window_bounds = array<i64: 1, 1, 32>}, {transform_indices = @transform_4, window_bounds = array<i64: 1, 32, 96>}, {transform_indices = @transform_5, window_bounds = array<i64: 1, 1, 96>}, {transform_indices = @transform_6, window_bounds = array<i64: 1, 32, 32>}, {transform_indices = @transform_7, window_bounds = array<i64: 1, 1, 32>}, {transform_indices = @transform_8, window_bounds = array<i64: 1, 1, 32>}, {transform_indices = @transform_9, window_bounds = array<i64: 1, 1, 32>}, {transform_indices = @transform_10, window_bounds = array<i64: 1, 32, 128>}, {transform_indices = @transform_11, window_bounds = array<i64: 1, 1, 128>}, {transform_indices = @transform_12, window_bounds = array<i64: 1, 128, 32>}, {transform_indices = @transform_13, window_bounds = array<i64: 1, 1, 32>}, {transform_indices = @transform_14, window_bounds = array<i64: 1, 8, 32>}]} {
    %c0_i32 = arith.constant 0 : i32
    %0 = arith.cmpi eq, %arg1, %c0_i32 : i32
    %1 = arith.extui %0 : i1 to i32
    %cst = arith.constant -1.000000e+09 : f32
    %c0_i32_0 = arith.constant 0 : i32
    %2 = arith.cmpi ne, %1, %c0_i32_0 : i32
    scf.if %2 {
      %c0_87 = arith.constant 0 : index
      %c0_88 = arith.constant 0 : index
      %c0_89 = arith.constant 0 : index
      %191 = vector.load %arg2[%c0_87, %c0_88, %c0_89] : memref<1x8x32xf32, #tpu.memory_space<vmem>>, vector<1x8x32xf32>
      %c0_90 = arith.constant 0 : index
      %c0_91 = arith.constant 0 : index
      %c0_92 = arith.constant 0 : index
      %192 = vector.load %arg16[%c0_90, %c0_91, %c0_92] : memref<1x8x32xf32, #tpu.memory_space<vmem>>, vector<1x8x32xf32>
      tpu.vector_store %arg16[%c0_90, %c0_91, %c0_92], %191 {strides = array<i32>} : memref<1x8x32xf32, #tpu.memory_space<vmem>>, vector<1x8x32xf32>,
      %193 = tpu.iota {dimensions = array<i32: 0>} : vector<8x8xi32>
      %194 = tpu.iota {dimensions = array<i32: 1>} : vector<8x8xi32>
      %c0_93 = arith.constant 0 : index
      %c0_94 = arith.constant 0 : index
      %c0_95 = arith.constant 0 : index
      %195 = vector.load %arg3[%c0_93, %c0_94, %c0_95] : memref<1x1x8xf32, #tpu.memory_space<vmem>>, vector<1x1x8xf32>
      %196 = vector.shape_cast %195 : vector<1x1x8xf32> to vector<1x8xf32>
      %197 = arith.cmpi sle, %194, %193 : vector<8x8xi32>
      %cst_96 = arith.constant 0.000000e+00 : f32
      %198 = vector.broadcast %cst_96 : f32 to vector<8x8xf32>
      %199 = vector.broadcast %cst : f32 to vector<8x8xf32>
      %200 = arith.select %197, %198, %199 : vector<8x8xi1>, vector<8x8xf32>
      %cst_97 = arith.constant 1.000000e+00 : f32
      %201 = vector.broadcast %cst_97 : f32 to vector<1x8xf32>
      %202 = arith.subf %201, %196 : vector<1x8xf32>
      %203 = vector.broadcast %cst : f32 to vector<1x8xf32>
      %204 = arith.mulf %202, %203 : vector<1x8xf32>
      %205 = vector.broadcast %204 : vector<1x8xf32> to vector<8x8xf32>
      %206 = arith.addf %200, %205 : vector<8x8xf32>
      %c0_98 = arith.constant 0 : index
      %c0_99 = arith.constant 0 : index
      %207 = vector.load %arg17[%c0_98, %c0_99] : memref<8x8xf32, #tpu.memory_space<vmem>>, vector<8x8xf32>
      tpu.vector_store %arg17[%c0_98, %c0_99], %206 {strides = array<i32>} : memref<8x8xf32, #tpu.memory_space<vmem>>, vector<8x8xf32>,
    } else {
    }
    %c0 = arith.constant 0 : index
    %c0_1 = arith.constant 0 : index
    %c0_2 = arith.constant 0 : index
    %3 = vector.load %arg16[%c0, %c0_1, %c0_2] : memref<1x8x32xf32, #tpu.memory_space<vmem>>, vector<1x8x32xf32>
    %4 = vector.shape_cast %3 : vector<1x8x32xf32> to vector<8x32xf32>
    %c0_3 = arith.constant 0 : index
    %c0_4 = arith.constant 0 : index
    %c0_5 = arith.constant 0 : index
    %5 = vector.load %arg4[%c0_3, %c0_4, %c0_5] : memref<1x1x32xf32, #tpu.memory_space<vmem>>, vector<1x1x32xf32>
    %6 = vector.shape_cast %5 : vector<1x1x32xf32> to vector<1x32xf32>
    %c0_6 = arith.constant 0 : index
    %c0_7 = arith.constant 0 : index
    %c0_8 = arith.constant 0 : index
    %7 = vector.load %arg5[%c0_6, %c0_7, %c0_8] : memref<1x1x32xf32, #tpu.memory_space<vmem>>, vector<1x1x32xf32>
    %8 = vector.shape_cast %7 : vector<1x1x32xf32> to vector<1x32xf32>
    %c0_9 = arith.constant 0 : index
    %c0_10 = arith.constant 0 : index
    %c0_11 = arith.constant 0 : index
    %9 = vector.load %arg10[%c0_9, %c0_10, %c0_11] : memref<1x1x32xf32, #tpu.memory_space<vmem>>, vector<1x1x32xf32>
    %10 = vector.shape_cast %9 : vector<1x1x32xf32> to vector<1x32xf32>
    %c0_12 = arith.constant 0 : index
    %c0_13 = arith.constant 0 : index
    %c0_14 = arith.constant 0 : index
    %11 = vector.load %arg11[%c0_12, %c0_13, %c0_14] : memref<1x1x32xf32, #tpu.memory_space<vmem>>, vector<1x1x32xf32>
    %12 = vector.shape_cast %11 : vector<1x1x32xf32> to vector<1x32xf32>
    %c0_15 = arith.constant 0 : index
    %c0_16 = arith.constant 0 : index
    %c0_17 = arith.constant 0 : index
    %13 = vector.load %arg6[%c0_15, %c0_16, %c0_17] : memref<1x32x96xbf16, #tpu.memory_space<vmem>>, vector<1x32x96xbf16>
    %14 = vector.shape_cast %13 : vector<1x32x96xbf16> to vector<32x96xbf16>
    %c0_18 = arith.constant 0 : index
    %c0_19 = arith.constant 0 : index
    %c0_20 = arith.constant 0 : index
    %15 = vector.load %arg7[%c0_18, %c0_19, %c0_20] : memref<1x1x96xf32, #tpu.memory_space<vmem>>, vector<1x1x96xf32>
    %16 = vector.shape_cast %15 : vector<1x1x96xf32> to vector<1x96xf32>
    %c0_21 = arith.constant 0 : index
    %c0_22 = arith.constant 0 : index
    %c0_23 = arith.constant 0 : index
    %17 = vector.load %arg8[%c0_21, %c0_22, %c0_23] : memref<1x32x32xbf16, #tpu.memory_space<vmem>>, vector<1x32x32xbf16>
    %18 = vector.shape_cast %17 : vector<1x32x32xbf16> to vector<32x32xbf16>
    %c0_24 = arith.constant 0 : index
    %c0_25 = arith.constant 0 : index
    %c0_26 = arith.constant 0 : index
    %19 = vector.load %arg9[%c0_24, %c0_25, %c0_26] : memref<1x1x32xf32, #tpu.memory_space<vmem>>, vector<1x1x32xf32>
    %20 = vector.shape_cast %19 : vector<1x1x32xf32> to vector<1x32xf32>
    %c0_27 = arith.constant 0 : index
    %c0_28 = arith.constant 0 : index
    %c0_29 = arith.constant 0 : index
    %21 = vector.load %arg15[%c0_27, %c0_28, %c0_29] : memref<1x1x32xf32, #tpu.memory_space<vmem>>, vector<1x1x32xf32>
    %22 = vector.shape_cast %21 : vector<1x1x32xf32> to vector<1x32xf32>
    %cst_30 = arith.constant dense<0.000000e+00> : vector<8xf32>
    %23 = vector.multi_reduction <add>, %4, %cst_30 [1] : vector<8x32xf32> to vector<8xf32>
    %24 = vector.shape_cast %23 : vector<8xf32> to vector<8x1xf32>
    %cst_31 = arith.constant 3.200000e+01 : f32
    %25 = vector.broadcast %cst_31 : f32 to vector<8x1xf32>
    %26 = arith.divf %24, %25 : vector<8x1xf32>
    %27 = vector.broadcast %26 : vector<8x1xf32> to vector<8x32xf32>
    %28 = arith.subf %4, %27 : vector<8x32xf32>
    %29 = arith.mulf %28, %28 : vector<8x32xf32>
    %cst_32 = arith.constant dense<0.000000e+00> : vector<8xf32>
    %30 = vector.multi_reduction <add>, %29, %cst_32 [1] : vector<8x32xf32> to vector<8xf32>
    %31 = vector.shape_cast %30 : vector<8xf32> to vector<8x1xf32>
    %cst_33 = arith.constant 3.200000e+01 : f32
    %32 = vector.broadcast %cst_33 : f32 to vector<8x1xf32>
    %33 = arith.divf %31, %32 : vector<8x1xf32>
    %34 = vector.broadcast %26 : vector<8x1xf32> to vector<8x32xf32>
    %35 = arith.subf %4, %34 : vector<8x32xf32>
    %cst_34 = arith.constant 9.99999974E-6 : f32
    %36 = vector.broadcast %cst_34 : f32 to vector<8x1xf32>
    %37 = arith.addf %33, %36 : vector<8x1xf32>
    %38 = math.rsqrt %37 : vector<8x1xf32>
    %39 = vector.broadcast %38 : vector<8x1xf32> to vector<8x32xf32>
    %40 = arith.mulf %35, %39 : vector<8x32xf32>
    %41 = vector.broadcast %6 : vector<1x32xf32> to vector<8x32xf32>
    %42 = arith.mulf %40, %41 : vector<8x32xf32>
    %43 = vector.broadcast %8 : vector<1x32xf32> to vector<8x32xf32>
    %44 = arith.addf %42, %43 : vector<8x32xf32>
    %45 = arith.truncf %44 : vector<8x32xf32> to vector<8x32xbf16>
    %cst_35 = arith.constant dense<0.000000e+00> : vector<8x96xf32>
    %46 = tpu.matmul %45, %14, %cst_35 {dimension_numbers = #tpu.dot_dimension_numbers<[1], [0], [0], [1], [0, 0, 1, 1], [], []>} : vector<8x32xbf16>, vector<32x96xbf16>, vector<8x96xf32> -> vector<8x96xf32>
    %47 = vector.broadcast %16 : vector<1x96xf32> to vector<8x96xf32>
    %48 = arith.addf %46, %47 : vector<8x96xf32>
    %49 = arith.truncf %48 : vector<8x96xf32> to vector<8x96xbf16>
    %c0_36 = arith.constant 0 : index
    %c0_37 = arith.constant 0 : index
    %50 = vector.load %arg17[%c0_36, %c0_37] : memref<8x8xf32, #tpu.memory_space<vmem>>, vector<8x8xf32>
    %51 = vector.extract_strided_slice %49 {offsets = [0, 0], sizes = [8, 8], strides = [1, 1]} : vector<8x96xbf16> to vector<8x8xbf16>
    %52 = vector.extract_strided_slice %49 {offsets = [0, 32], sizes = [8, 8], strides = [1, 1]} : vector<8x96xbf16> to vector<8x8xbf16>
    %53 = vector.extract_strided_slice %49 {offsets = [0, 64], sizes = [8, 8], strides = [1, 1]} : vector<8x96xbf16> to vector<8x8xbf16>
    %cst_38 = arith.constant dense<0.000000e+00> : vector<8x8xf32>
    %54 = tpu.matmul %51, %52, %cst_38 {dimension_numbers = #tpu.dot_dimension_numbers<[1], [1], [0], [0], [0, 0, 1, 0], [], []>} : vector<8x8xbf16>, vector<8x8xbf16>, vector<8x8xf32> -> vector<8x8xf32>
    %cst_39 = arith.constant 0.353553385 : f32
    %55 = vector.broadcast %cst_39 : f32 to vector<8x8xf32>
    %56 = arith.mulf %54, %55 : vector<8x8xf32>
    %57 = arith.addf %56, %50 : vector<8x8xf32>
    %cst_40 = arith.constant dense<0xFF800000> : vector<8xf32>
    %58 = vector.multi_reduction <maximumf>, %57, %cst_40 [1] : vector<8x8xf32> to vector<8xf32>
    %59 = vector.shape_cast %58 : vector<8xf32> to vector<8x1xf32>
    %60 = vector.broadcast %59 : vector<8x1xf32> to vector<8x8xf32>
    %61 = arith.subf %57, %60 : vector<8x8xf32>
    %62 = math.exp %61 : vector<8x8xf32>
    %cst_41 = arith.constant dense<0.000000e+00> : vector<8xf32>
    %63 = vector.multi_reduction <add>, %62, %cst_41 [1] : vector<8x8xf32> to vector<8xf32>
    %64 = vector.shape_cast %63 : vector<8xf32> to vector<8x1xf32>
    %65 = tpu.reciprocal %64 {approx = true} : vector<8x1xf32> -> vector<8x1xf32>
    %66 = arith.truncf %62 : vector<8x8xf32> to vector<8x8xbf16>
    %cst_42 = arith.constant dense<0.000000e+00> : vector<8x8xf32>
    %67 = tpu.matmul %66, %53, %cst_42 {dimension_numbers = #tpu.dot_dimension_numbers<[1], [0], [0], [1], [0, 0, 1, 1], [], []>} : vector<8x8xbf16>, vector<8x8xbf16>, vector<8x8xf32> -> vector<8x8xf32>
    %68 = vector.broadcast %65 : vector<8x1xf32> to vector<8x8xf32>
    %69 = arith.mulf %67, %68 : vector<8x8xf32>
    %70 = vector.extract_strided_slice %49 {offsets = [0, 8], sizes = [8, 8], strides = [1, 1]} : vector<8x96xbf16> to vector<8x8xbf16>
    %71 = vector.extract_strided_slice %49 {offsets = [0, 40], sizes = [8, 8], strides = [1, 1]} : vector<8x96xbf16> to vector<8x8xbf16>
    %72 = vector.extract_strided_slice %49 {offsets = [0, 72], sizes = [8, 8], strides = [1, 1]} : vector<8x96xbf16> to vector<8x8xbf16>
    %cst_43 = arith.constant dense<0.000000e+00> : vector<8x8xf32>
    %73 = tpu.matmul %70, %71, %cst_43 {dimension_numbers = #tpu.dot_dimension_numbers<[1], [1], [0], [0], [0, 0, 1, 0], [], []>} : vector<8x8xbf16>, vector<8x8xbf16>, vector<8x8xf32> -> vector<8x8xf32>
    %cst_44 = arith.constant 0.353553385 : f32
    %74 = vector.broadcast %cst_44 : f32 to vector<8x8xf32>
    %75 = arith.mulf %73, %74 : vector<8x8xf32>
    %76 = arith.addf %75, %50 : vector<8x8xf32>
    %cst_45 = arith.constant dense<0xFF800000> : vector<8xf32>
    %77 = vector.multi_reduction <maximumf>, %76, %cst_45 [1] : vector<8x8xf32> to vector<8xf32>
    %78 = vector.shape_cast %77 : vector<8xf32> to vector<8x1xf32>
    %79 = vector.broadcast %78 : vector<8x1xf32> to vector<8x8xf32>
    %80 = arith.subf %76, %79 : vector<8x8xf32>
    %81 = math.exp %80 : vector<8x8xf32>
    %cst_46 = arith.constant dense<0.000000e+00> : vector<8xf32>
    %82 = vector.multi_reduction <add>, %81, %cst_46 [1] : vector<8x8xf32> to vector<8xf32>
    %83 = vector.shape_cast %82 : vector<8xf32> to vector<8x1xf32>
    %84 = tpu.reciprocal %83 {approx = true} : vector<8x1xf32> -> vector<8x1xf32>
    %85 = arith.truncf %81 : vector<8x8xf32> to vector<8x8xbf16>
    %cst_47 = arith.constant dense<0.000000e+00> : vector<8x8xf32>
    %86 = tpu.matmul %85, %72, %cst_47 {dimension_numbers = #tpu.dot_dimension_numbers<[1], [0], [0], [1], [0, 0, 1, 1], [], []>} : vector<8x8xbf16>, vector<8x8xbf16>, vector<8x8xf32> -> vector<8x8xf32>
    %87 = vector.broadcast %84 : vector<8x1xf32> to vector<8x8xf32>
    %88 = arith.mulf %86, %87 : vector<8x8xf32>
    %89 = tpu.concatenate %69, %88 in 1 : vector<8x8xf32>, vector<8x8xf32> -> vector<8x16xf32>
    %90 = arith.truncf %89 : vector<8x16xf32> to vector<8x16xbf16>
    %c0_48 = arith.constant 0 : index
    %c0_49 = arith.constant 0 : index
    %91 = vector.load %arg18[%c0_48, %c0_49] : memref<8x32xbf16, #tpu.memory_space<vmem>>, vector<8x16xbf16>
    tpu.vector_store %arg18[%c0_48, %c0_49], %90 {strides = array<i32>} : memref<8x32xbf16, #tpu.memory_space<vmem>>, vector<8x16xbf16>,
    %92 = vector.extract_strided_slice %49 {offsets = [0, 16], sizes = [8, 8], strides = [1, 1]} : vector<8x96xbf16> to vector<8x8xbf16>
    %93 = vector.extract_strided_slice %49 {offsets = [0, 48], sizes = [8, 8], strides = [1, 1]} : vector<8x96xbf16> to vector<8x8xbf16>
    %94 = vector.extract_strided_slice %49 {offsets = [0, 80], sizes = [8, 8], strides = [1, 1]} : vector<8x96xbf16> to vector<8x8xbf16>
    %cst_50 = arith.constant dense<0.000000e+00> : vector<8x8xf32>
    %95 = tpu.matmul %92, %93, %cst_50 {dimension_numbers = #tpu.dot_dimension_numbers<[1], [1], [0], [0], [0, 0, 1, 0], [], []>} : vector<8x8xbf16>, vector<8x8xbf16>, vector<8x8xf32> -> vector<8x8xf32>
    %cst_51 = arith.constant 0.353553385 : f32
    %96 = vector.broadcast %cst_51 : f32 to vector<8x8xf32>
    %97 = arith.mulf %95, %96 : vector<8x8xf32>
    %98 = arith.addf %97, %50 : vector<8x8xf32>
    %cst_52 = arith.constant dense<0xFF800000> : vector<8xf32>
    %99 = vector.multi_reduction <maximumf>, %98, %cst_52 [1] : vector<8x8xf32> to vector<8xf32>
    %100 = vector.shape_cast %99 : vector<8xf32> to vector<8x1xf32>
    %101 = vector.broadcast %100 : vector<8x1xf32> to vector<8x8xf32>
    %102 = arith.subf %98, %101 : vector<8x8xf32>
    %103 = math.exp %102 : vector<8x8xf32>
    %cst_53 = arith.constant dense<0.000000e+00> : vector<8xf32>
    %104 = vector.multi_reduction <add>, %103, %cst_53 [1] : vector<8x8xf32> to vector<8xf32>
    %105 = vector.shape_cast %104 : vector<8xf32> to vector<8x1xf32>
    %106 = tpu.reciprocal %105 {approx = true} : vector<8x1xf32> -> vector<8x1xf32>
    %107 = arith.truncf %103 : vector<8x8xf32> to vector<8x8xbf16>
    %cst_54 = arith.constant dense<0.000000e+00> : vector<8x8xf32>
    %108 = tpu.matmul %107, %94, %cst_54 {dimension_numbers = #tpu.dot_dimension_numbers<[1], [0], [0], [1], [0, 0, 1, 1], [], []>} : vector<8x8xbf16>, vector<8x8xbf16>, vector<8x8xf32> -> vector<8x8xf32>
    %109 = vector.broadcast %106 : vector<8x1xf32> to vector<8x8xf32>
    %110 = arith.mulf %108, %109 : vector<8x8xf32>
    %111 = vector.extract_strided_slice %49 {offsets = [0, 24], sizes = [8, 8], strides = [1, 1]} : vector<8x96xbf16> to vector<8x8xbf16>
    %112 = vector.extract_strided_slice %49 {offsets = [0, 56], sizes = [8, 8], strides = [1, 1]} : vector<8x96xbf16> to vector<8x8xbf16>
    %113 = vector.extract_strided_slice %49 {offsets = [0, 88], sizes = [8, 8], strides = [1, 1]} : vector<8x96xbf16> to vector<8x8xbf16>
    %cst_55 = arith.constant dense<0.000000e+00> : vector<8x8xf32>
    %114 = tpu.matmul %111, %112, %cst_55 {dimension_numbers = #tpu.dot_dimension_numbers<[1], [1], [0], [0], [0, 0, 1, 0], [], []>} : vector<8x8xbf16>, vector<8x8xbf16>, vector<8x8xf32> -> vector<8x8xf32>
    %cst_56 = arith.constant 0.353553385 : f32
    %115 = vector.broadcast %cst_56 : f32 to vector<8x8xf32>
    %116 = arith.mulf %114, %115 : vector<8x8xf32>
    %117 = arith.addf %116, %50 : vector<8x8xf32>
    %cst_57 = arith.constant dense<0xFF800000> : vector<8xf32>
    %118 = vector.multi_reduction <maximumf>, %117, %cst_57 [1] : vector<8x8xf32> to vector<8xf32>
    %119 = vector.shape_cast %118 : vector<8xf32> to vector<8x1xf32>
    %120 = vector.broadcast %119 : vector<8x1xf32> to vector<8x8xf32>
    %121 = arith.subf %117, %120 : vector<8x8xf32>
    %122 = math.exp %121 : vector<8x8xf32>
    %cst_58 = arith.constant dense<0.000000e+00> : vector<8xf32>
    %123 = vector.multi_reduction <add>, %122, %cst_58 [1] : vector<8x8xf32> to vector<8xf32>
    %124 = vector.shape_cast %123 : vector<8xf32> to vector<8x1xf32>
    %125 = tpu.reciprocal %124 {approx = true} : vector<8x1xf32> -> vector<8x1xf32>
    %126 = arith.truncf %122 : vector<8x8xf32> to vector<8x8xbf16>
    %cst_59 = arith.constant dense<0.000000e+00> : vector<8x8xf32>
    %127 = tpu.matmul %126, %113, %cst_59 {dimension_numbers = #tpu.dot_dimension_numbers<[1], [0], [0], [1], [0, 0, 1, 1], [], []>} : vector<8x8xbf16>, vector<8x8xbf16>, vector<8x8xf32> -> vector<8x8xf32>
    %128 = vector.broadcast %125 : vector<8x1xf32> to vector<8x8xf32>
    %129 = arith.mulf %127, %128 : vector<8x8xf32>
    %130 = tpu.concatenate %110, %129 in 1 : vector<8x8xf32>, vector<8x8xf32> -> vector<8x16xf32>
    %131 = arith.truncf %130 : vector<8x16xf32> to vector<8x16xbf16>
    %c0_60 = arith.constant 0 : index
    %c16 = arith.constant 16 : index
    %132 = vector.load %arg18[%c0_60, %c16] : memref<8x32xbf16, #tpu.memory_space<vmem>>, vector<8x16xbf16>
    tpu.vector_store %arg18[%c0_60, %c16], %131 {strides = array<i32>} : memref<8x32xbf16, #tpu.memory_space<vmem>>, vector<8x16xbf16>,
    %c0_61 = arith.constant 0 : index
    %c0_62 = arith.constant 0 : index
    %133 = vector.load %arg18[%c0_61, %c0_62] : memref<8x32xbf16, #tpu.memory_space<vmem>>, vector<8x32xbf16>
    %cst_63 = arith.constant dense<0.000000e+00> : vector<8x32xf32>
    %134 = tpu.matmul %133, %18, %cst_63 {dimension_numbers = #tpu.dot_dimension_numbers<[1], [0], [0], [1], [0, 0, 1, 1], [], []>} : vector<8x32xbf16>, vector<32x32xbf16>, vector<8x32xf32> -> vector<8x32xf32>
    %135 = vector.broadcast %20 : vector<1x32xf32> to vector<8x32xf32>
    %136 = arith.addf %134, %135 : vector<8x32xf32>
    %137 = arith.addf %4, %136 : vector<8x32xf32>
    %cst_64 = arith.constant dense<0.000000e+00> : vector<8xf32>
    %138 = vector.multi_reduction <add>, %137, %cst_64 [1] : vector<8x32xf32> to vector<8xf32>
    %139 = vector.shape_cast %138 : vector<8xf32> to vector<8x1xf32>
    %cst_65 = arith.constant 3.200000e+01 : f32
    %140 = vector.broadcast %cst_65 : f32 to vector<8x1xf32>
    %141 = arith.divf %139, %140 : vector<8x1xf32>
    %142 = vector.broadcast %141 : vector<8x1xf32> to vector<8x32xf32>
    %143 = arith.subf %137, %142 : vector<8x32xf32>
    %144 = arith.mulf %143, %143 : vector<8x32xf32>
    %cst_66 = arith.constant dense<0.000000e+00> : vector<8xf32>
    %145 = vector.multi_reduction <add>, %144, %cst_66 [1] : vector<8x32xf32> to vector<8xf32>
    %146 = vector.shape_cast %145 : vector<8xf32> to vector<8x1xf32>
    %cst_67 = arith.constant 3.200000e+01 : f32
    %147 = vector.broadcast %cst_67 : f32 to vector<8x1xf32>
    %148 = arith.divf %146, %147 : vector<8x1xf32>
    %149 = vector.broadcast %141 : vector<8x1xf32> to vector<8x32xf32>
    %150 = arith.subf %137, %149 : vector<8x32xf32>
    %cst_68 = arith.constant 9.99999974E-6 : f32
    %151 = vector.broadcast %cst_68 : f32 to vector<8x1xf32>
    %152 = arith.addf %148, %151 : vector<8x1xf32>
    %153 = math.rsqrt %152 : vector<8x1xf32>
    %154 = vector.broadcast %153 : vector<8x1xf32> to vector<8x32xf32>
    %155 = arith.mulf %150, %154 : vector<8x32xf32>
    %156 = vector.broadcast %10 : vector<1x32xf32> to vector<8x32xf32>
    %157 = arith.mulf %155, %156 : vector<8x32xf32>
    %158 = vector.broadcast %12 : vector<1x32xf32> to vector<8x32xf32>
    %159 = arith.addf %157, %158 : vector<8x32xf32>
    %160 = arith.truncf %159 : vector<8x32xf32> to vector<8x32xbf16>
    %161 = vector.broadcast %22 : vector<1x32xf32> to vector<8x32xf32>
    %162 = arith.addf %137, %161 : vector<8x32xf32>
    %c0_69 = arith.constant 0 : index
    %c0_70 = arith.constant 0 : index
    %c0_71 = arith.constant 0 : index
    %163 = vector.load %arg12[%c0_69, %c0_70, %c0_71] : memref<1x32x128xbf16, #tpu.memory_space<vmem>>, vector<1x32x128xbf16>
    %164 = vector.shape_cast %163 : vector<1x32x128xbf16> to vector<32x128xbf16>
    %c0_72 = arith.constant 0 : index
    %c0_73 = arith.constant 0 : index
    %c0_74 = arith.constant 0 : index
    %165 = vector.load %arg13[%c0_72, %c0_73, %c0_74] : memref<1x1x128xf32, #tpu.memory_space<vmem>>, vector<1x1x128xf32>
    %166 = vector.shape_cast %165 : vector<1x1x128xf32> to vector<1x128xf32>
    %c0_75 = arith.constant 0 : index
    %c0_76 = arith.constant 0 : index
    %c0_77 = arith.constant 0 : index
    %167 = vector.load %arg14[%c0_75, %c0_76, %c0_77] : memref<1x128x32xbf16, #tpu.memory_space<vmem>>, vector<1x128x32xbf16>
    %168 = vector.shape_cast %167 : vector<1x128x32xbf16> to vector<128x32xbf16>
    %cst_78 = arith.constant dense<0.000000e+00> : vector<8x128xf32>
    %169 = tpu.matmul %160, %164, %cst_78 {dimension_numbers = #tpu.dot_dimension_numbers<[1], [0], [0], [1], [0, 0, 1, 1], [], []>} : vector<8x32xbf16>, vector<32x128xbf16>, vector<8x128xf32> -> vector<8x128xf32>
    %170 = vector.broadcast %166 : vector<1x128xf32> to vector<8x128xf32>
    %171 = arith.addf %169, %170 : vector<8x128xf32>
    %cst_79 = arith.constant 5.000000e-01 : f32
    %172 = vector.broadcast %cst_79 : f32 to vector<8x128xf32>
    %173 = arith.mulf %172, %171 : vector<8x128xf32>
    %cst_80 = arith.constant 4.471500e-02 : f32
    %174 = vector.broadcast %cst_80 : f32 to vector<8x128xf32>
    %175 = arith.mulf %174, %171 : vector<8x128xf32>
    %176 = arith.mulf %175, %171 : vector<8x128xf32>
    %177 = arith.mulf %176, %171 : vector<8x128xf32>
    %178 = arith.addf %171, %177 : vector<8x128xf32>
    %cst_81 = arith.constant 0.797884583 : f32
    %179 = vector.broadcast %cst_81 : f32 to vector<8x128xf32>
    %180 = arith.mulf %179, %178 : vector<8x128xf32>
    %181 = math.tanh %180 : vector<8x128xf32>
    %cst_82 = arith.constant 1.000000e+00 : f32
    %182 = vector.broadcast %cst_82 : f32 to vector<8x128xf32>
    %183 = arith.addf %182, %181 : vector<8x128xf32>
    %184 = arith.mulf %173, %183 : vector<8x128xf32>
    %185 = arith.truncf %184 : vector<8x128xf32> to vector<8x128xbf16>
    %cst_83 = arith.constant dense<0.000000e+00> : vector<8x32xf32>
    %186 = tpu.matmul %185, %168, %cst_83 {dimension_numbers = #tpu.dot_dimension_numbers<[1], [0], [0], [1], [0, 0, 1, 1], [], []>} : vector<8x128xbf16>, vector<128x32xbf16>, vector<8x32xf32> -> vector<8x32xf32>
    %187 = arith.addf %162, %186 : vector<8x32xf32>
    %c0_84 = arith.constant 0 : index
    %c0_85 = arith.constant 0 : index
    %c0_86 = arith.constant 0 : index
    %188 = vector.load %arg16[%c0_84, %c0_85, %c0_86] : memref<1x8x32xf32, #tpu.memory_space<vmem>>, vector<1x8x32xf32>
    %189 = vector.shape_cast %188 : vector<1x8x32xf32> to vector<8x32xf32>
    %190 = vector.shape_cast %187 : vector<8x32xf32> to vector<1x8x32xf32>
    tpu.vector_store %arg16[%c0_84, %c0_85, %c0_86], %190 {strides = array<i32>} : memref<1x8x32xf32, #tpu.memory_space<vmem>>, vector<1x8x32xf32>,
    return
  }
  func.func @transform_0(%arg0: i32, %arg1: i32) -> (i32, i32, i32) {
    %c0_i32 = arith.constant 0 : i32
    %c0_i32_0 = arith.constant 0 : i32
    %c0_i32_1 = arith.constant 0 : i32
    return %arg0, %c0_i32, %c0_i32_0 : i32, i32, i32
  }
  func.func @transform_1(%arg0: i32, %arg1: i32) -> (i32, i32, i32) {
    %c0_i32 = arith.constant 0 : i32
    %c0_i32_0 = arith.constant 0 : i32
    %c0_i32_1 = arith.constant 0 : i32
    return %arg0, %c0_i32, %c0_i32_0 : i32, i32, i32
  }
  func.func @transform_2(%arg0: i32, %arg1: i32) -> (i32, i32, i32) {
    %c0_i32 = arith.constant 0 : i32
    %c0_i32_0 = arith.constant 0 : i32
    %c0_i32_1 = arith.constant 0 : i32
    return %arg1, %c0_i32, %c0_i32_0 : i32, i32, i32
  }
  func.func @transform_3(%arg0: i32, %arg1: i32) -> (i32, i32, i32) {
    %c0_i32 = arith.constant 0 : i32
    %c0_i32_0 = arith.constant 0 : i32
    %c0_i32_1 = arith.constant 0 : i32
    return %arg1, %c0_i32, %c0_i32_0 : i32, i32, i32
  }
  func.func @transform_4(%arg0: i32, %arg1: i32) -> (i32, i32, i32) {
    %c0_i32 = arith.constant 0 : i32
    %c0_i32_0 = arith.constant 0 : i32
    %c0_i32_1 = arith.constant 0 : i32
    return %arg1, %c0_i32, %c0_i32_0 : i32, i32, i32
  }
  func.func @transform_5(%arg0: i32, %arg1: i32) -> (i32, i32, i32) {
    %c0_i32 = arith.constant 0 : i32
    %c0_i32_0 = arith.constant 0 : i32
    %c0_i32_1 = arith.constant 0 : i32
    return %arg1, %c0_i32, %c0_i32_0 : i32, i32, i32
  }
  func.func @transform_6(%arg0: i32, %arg1: i32) -> (i32, i32, i32) {
    %c0_i32 = arith.constant 0 : i32
    %c0_i32_0 = arith.constant 0 : i32
    %c0_i32_1 = arith.constant 0 : i32
    return %arg1, %c0_i32, %c0_i32_0 : i32, i32, i32
  }
  func.func @transform_7(%arg0: i32, %arg1: i32) -> (i32, i32, i32) {
    %c0_i32 = arith.constant 0 : i32
    %c0_i32_0 = arith.constant 0 : i32
    %c0_i32_1 = arith.constant 0 : i32
    return %arg1, %c0_i32, %c0_i32_0 : i32, i32, i32
  }
  func.func @transform_8(%arg0: i32, %arg1: i32) -> (i32, i32, i32) {
    %c0_i32 = arith.constant 0 : i32
    %c0_i32_0 = arith.constant 0 : i32
    %c0_i32_1 = arith.constant 0 : i32
    return %arg1, %c0_i32, %c0_i32_0 : i32, i32, i32
  }
  func.func @transform_9(%arg0: i32, %arg1: i32) -> (i32, i32, i32) {
    %c0_i32 = arith.constant 0 : i32
    %c0_i32_0 = arith.constant 0 : i32
    %c0_i32_1 = arith.constant 0 : i32
    return %arg1, %c0_i32, %c0_i32_0 : i32, i32, i32
  }
  func.func @transform_10(%arg0: i32, %arg1: i32) -> (i32, i32, i32) {
    %c0_i32 = arith.constant 0 : i32
    %c0_i32_0 = arith.constant 0 : i32
    %c0_i32_1 = arith.constant 0 : i32
    return %arg1, %c0_i32, %c0_i32_0 : i32, i32, i32
  }
  func.func @transform_11(%arg0: i32, %arg1: i32) -> (i32, i32, i32) {
    %c0_i32 = arith.constant 0 : i32
    %c0_i32_0 = arith.constant 0 : i32
    %c0_i32_1 = arith.constant 0 : i32
    return %arg1, %c0_i32, %c0_i32_0 : i32, i32, i32
  }
  func.func @transform_12(%arg0: i32, %arg1: i32) -> (i32, i32, i32) {
    %c0_i32 = arith.constant 0 : i32
    %c0_i32_0 = arith.constant 0 : i32
    %c0_i32_1 = arith.constant 0 : i32
    return %arg1, %c0_i32, %c0_i32_0 : i32, i32, i32
  }
  func.func @transform_13(%arg0: i32, %arg1: i32) -> (i32, i32, i32) {
    %c0_i32 = arith.constant 0 : i32
    %c0_i32_0 = arith.constant 0 : i32
    %c0_i32_1 = arith.constant 0 : i32
    return %arg1, %c0_i32, %c0_i32_0 : i32, i32, i32
  }
  func.func @transform_14(%arg0: i32, %arg1: i32) -> (i32, i32, i32) {
    %c0_i32 = arith.constant 0 : i32
    %c0_i32_0 = arith.constant 0 : i32
    %c0_i32_1 = arith.constant 0 : i32
    return %arg0, %c0_i32, %c0_i32_0 : i32, i32, i32
  }
}

</mosaic_0001>

<bundles_post_ra>
// kernel: tpu_custom_call.1
= control target key start
LH: loop header
LB: loop body
LE: loop exit
PB: predicated region body
PF: predicated region fallthrough
CT: control target
= control target key end

     0   :  { %s2635_s0 = inlined_call_operand.vmem [shape: f32[2,8,32], index: 0, kind: input, shape index: {}]   ;;  %s2636_s1 = inlined_call_operand.vmem [shape: f32[2,1,8], index: 1, kind: input, shape index: {}]   ;;  %s2637_s2 = inlined_call_operand.vmem [shape: f32[2,1,32], index: 2, kind: input, shape index: {}]   ;;  %s2638_s3 = inlined_call_operand.vmem [shape: f32[2,1,32], index: 3, kind: input, shape index: {}]   ;;  %s2639_s4 = inlined_call_operand.vmem [shape: bf16[2,32,96], index: 4, kind: input, shape index: {}]   ;;  %s2640_s5 = inlined_call_operand.vmem [shape: f32[2,1,96], index: 5, kind: input, shape index: {}]   ;;  %s2641_s6 = inlined_call_operand.vmem [shape: bf16[2,32,32], index: 6, kind: input, shape index: {}]   ;;  %s2642_s7 = inlined_call_operand.vmem [shape: f32[2,1,32], index: 7, kind: input, shape index: {}]   ;;  %s2643_s8 = inlined_call_operand.vmem [shape: f32[2,1,32], index: 8, kind: input, shape index: {}]   ;;  %s2644_s9 = inlined_call_operand.vmem [shape: f32[2,1,32], index: 9, kind: input, shape index: {}]   ;;  %s2645_s10 = inlined_call_operand.vmem [shape: bf16[2,32,128], index: 10, kind: input, shape index: {}]   ;;  %s2646_s11 = inlined_call_operand.vmem [shape: f32[2,1,128], index: 11, kind: input, shape index: {}]   ;;  %s2647_s12 = inlined_call_operand.vmem [shape: bf16[2,128,32], index: 12, kind: input, shape index: {}]   ;;  %s2648_s13 = inlined_call_operand.vmem [shape: f32[2,1,32], index: 13, kind: input, shape index: {}]   ;;  %s2649_s14 = inlined_call_operand.hbm [shape: f32[2,8,32], index: 14, kind: output, shape index: {}]  }
   0x1   :  { %2665 = sst [smem:[#allocation20_spill]] %s2635_s0 }
   0x2   :  { %2666 = sst [smem:[#allocation21_spill]] %s2636_s1 }
   0x3   :  { %2667 = sst [smem:[#allocation22_spill]] %s2639_s4 }
   0x4   :  { %2668 = sst [smem:[#allocation23_spill]] %s2641_s6 }
   0x5   :  { %2669 = sst [smem:[#allocation24_spill]] %s2642_s7 }
   0x6   :  { %2670 = sst [smem:[#allocation25_spill]] %s2643_s8 }
   0x7   :  { %2671 = sst [smem:[#allocation26_spill]] %s2646_s11 }
   0x8   :  { %2672 = sst [smem:[#allocation27_spill]] %s2647_s12 }
   0x9   :  { %2673 = sst [smem:[#allocation28_spill]] %s2648_s13 }
   0xa   :  { %2674 = sst [smem:[#allocation29_spill]] %s2649_s14 }
   0xb   :  { %19 = vsyncpa [#allocation5], 0 }
   0xc   :  { %21 = vsyncpa [#allocation5 + $0x1], 0  ;;  %s2274_s29 = smov 0   ;;  %s2276_s30 = smov 0  }
   0xd   :  { %s2278_s15 = smov 0   ;;  %s2280_s16 = smov 0  }
   0xe   :  { %s2282_s17 = smov 0   ;;  %s2284_s18 = smov 0  }
   0xf   :  { %s2286_s19 = smov 0   ;;  %s2288_s20 = smov 0  }
  0x10 LB: > { %2675 = sst [smem:[#allocation7_spill]] %s2152_s29  ;;  %s1780_s21 = sadd.s32 4294967295, %s2180_s20   ;;  %s2180_s20 = sphi %s2288_s20, %s27_s20   ;;  %s2176_s19 = sphi %s2286_s19, %s2723_s19   ;;  %s2172_s18 = sphi %s2284_s18, %s2722_s18   ;;  %s2168_s17 = sphi %s2282_s17, %s2721_s17   ;;  %s2164_s16 = sphi %s2280_s16, %s2720_s16   ;;  %s2160_s15 = sphi %s2278_s15, %s2719_s15   ;;  %s2156_s30 = sphi %s2276_s30, %s2718_s30   ;;  %s2152_s29 = sphi %s2274_s29, %s2717_s29  }
  0x11   : > { %2676 = sst [smem:[#allocation8_spill]] %s2156_s30  ;;  %s1781_s22 = sadd.s32 4294967294, %s2180_s20  }
  0x12   : > { %2677 = sst [smem:[#allocation9_spill]] %s2160_s15  ;;  %s36_s23 = sadd.s32 1, %s2172_s18 }
  0x13   : > { %2678 = sst [smem:[#allocation10_spill]] %s2164_s16  ;;  %p37_p0 = scmp.ge.s32.totalorder %s36_s23, 2 }
  0x14   : > { %2679 = sst [smem:[#allocation11_spill]] %s2168_s17  ;;  %s39_s24 = sadd.s32 1, %s2176_s19 }
  0x15   : > { %2680 = sst [smem:[#allocation12_spill]] %s2172_s18  ;;  %p420_p1 = scmp.ne.s32.totalorder %s2160_s15, %s2156_s30 }
  0x16   : > { %2681 = sst [smem:[#allocation13_spill]] %s2176_s19  ;;  %p421_p2 = scmp.eq.s32.totalorder %s1780_s21, 3 }
  0x17   : > { %2682 = sst [smem:[#allocation14_spill]] %s2180_s20  ;;  %s2725_s23 = smov (%p37_p0, %s36_s23), 0 }
  0x18   : > { %2683 = sst [smem:[#allocation15_spill]] %s2725_s23  ;;  %s2727_s24 = smov (!%p37_p0, %s39_s24), %s2176_s19 }
  0x19   : > { %p2323_p3 = por %p421_p2, %p420_p1  ;;  %p426_p4 = scmp.ne.s32.totalorder %s2156_s30, %s2152_s29 }
  0x1a   : > { %p41_p5 = scmp.ge.s32.totalorder %s2727_s24, 2  ;;  %p427_p6 = scmp.eq.s32.totalorder %s1781_s22, 3 }
  0x1b   : > { %s2684_s25 = scalar_select %p2323_p3, 1, 0 }
  0x1c   : > { %p1784_p7 = scmp.ge.s32.totalorder %s2180_s20, 1  ;;  %p538_p8 = scmp.lt.s32.totalorder %s2180_s20, 5 }
  0x1d   : > { %2685 = sst [smem:[#allocation16_spill]] %s2684_s25  ;;  %s2729_s24 = smov (%p41_p5, %s2727_s24), 0 }
  0x1e   : > { %2686 = sst [smem:[#allocation17_spill]] %s2729_s24  ;;  %p2333_p9 = por %p427_p6, %p426_p4 }
  0x1f   : > { %p539_p10 = pnand %p1784_p7, %p538_p8  ;;  %s407_s27 = ssub.s32 %s2176_s19, %s2729_s24 }
  0x20   : > { %s2687_s26 = scalar_select %p2333_p9, 1, 0 }
  0x21   : > { %s410_s28 = sadd.s32 1, %s2160_s15  ;;  %p408_p11 = scmp.eq.s32.totalorder %s407_s27, 0 }
  0x22   : > { %2688 = sst [smem:[#allocation18_spill]] %s2687_s26  ;;  %542 = sbr.rel (%p539_p10) target bundleno = 2499 (0x9c3), region = 76 }
  0x23   : > { %s2341_s21 = scalar_select %p408_p11, %s2160_s15, %s410_s28  }
  0x24   : > { %s2654_s22 = sand.u32 (!%p539_p10), 1, %s2156_s30   ;;  %p630_p12 = scmp.lt.s32.totalorder (!%p539_p10), %s2168_s17, 1 }
  0x25   : > { %2689 = sst [smem:[#allocation19_spill]] %s2341_s21  ;;  %s1785_s23 = sshll.u32 (!%p539_p10), %s2654_s22, 3 }
  0x26   : > { %p637_p13 = scmp.lt.s32.totalorder (!%p539_p10), %s2164_s16, 1  ;;  %s2690_s1 = sld [smem:[#allocation21_spill]] (!%p539_p10) }
  0x27   : > { %s631_s18 = scalar_select %p630_p12, %s2168_s17, 1 }
  0x28   : > { %s2350_s26 = scalar_select %p637_p13, %s2164_s16, 1 }
  0x29   : > { %s1786_s27 = sshll.u32 %s631_s18, 3  ;;  %s2691_s0 = sld [smem:[#allocation20_spill]] }
  0x2a   : > { %s1834_s16 = sshll.u32 %s2350_s26, 4  ;;  %s2692_s4 = sld [smem:[#allocation22_spill]] }
  0x2b   : > { %s2693_s6 = sld [smem:[#allocation23_spill]]  ;;  %s2412_s12 = scalar_lea.vmem [#allocation4], %s1785_s23 }
  0x2c   : > { %s636_s19 = scalar_lea.vmem %s2690_s1, %s631_s18  ;;  %s2396_s18 = scalar_lea.vmem %s2645_s10, %s1834_s16 }
  0x2d   : > { %s2696_s28 = sld [smem:[#allocation26_spill]] }
  0x2e   : > { %s2697_s30 = sld [smem:[#allocation28_spill]] }
  0x2f   : > { %s633_s15 = scalar_lea.vmem %s2691_s0, %s1786_s27  ;;  %s664_s0 = scalar_lea.vmem %s2644_s9, %s2350_s26 }
  0x30   : > { %s2370_s11 = scalar_lea.vmem %s2692_s4, %s1834_s16  ;;  %s2698_s14 = sld [smem:[#allocation27_spill]] }
  0x31   : > { %s2379_s27 = scalar_lea.vmem %s2693_s6, %s1834_s16  ;;  %s1837_s6 = sshll.u32 %s2350_s26, 6 }
  0x32   : > { %s2699_s13 = sld [smem:[#allocation10_spill]] }
  0x33   : > { %s672_s4 = scalar_lea.vmem %s2696_s28, %s2350_s26 }
  0x34   : > { %s680_s7 = scalar_lea.vmem %s2697_s30, %s2350_s26 }
  0x36   : > { %s2410_s8 = scalar_lea.vmem %s2698_s14, %s1837_s6 }
  0x38   : > { %p1795_p0 = scmp.ne.s32.totalorder %s2699_s13, 0 }
  0x3a   : > { %685 = sbr.rel (%p1795_p0) target bundleno = 74 (0x4a), region = 80 }
  0x3f   : > { %v686_v0 = vld [vmem:[%s633_s15] sm:$0xff]  ;;  %vm687_vm0 = vcmask 261120   ;;  %v689_v1 = vlaneseq  ;;  %v2182_v8 = vmov -1e+09   ;;  %vm705_vm2 = vcmask 64512  }
  0x40   : > { %v693_v2 = vld [vmem:[%s636_s19] sm:$0x1]  ;;  %688 = vst.msk [vmem:[%s2412_s12] sm:$0xff] %vm687_vm0, %v686_v0 }
  0x41   : > { %v696_v3 = vsub.f32 1.0, %v693_v2  ;;  %v690_v4 = vshrl.u32 %v689_v1, 7  ;;  %v692_v5 = vand.u32 127, %v689_v1 }
  0x43   : > { %v697_v6 = vmul.f32 -1e+09, %v696_v3  ;;  %vm694_vm1 = vcmp.le.s32.totalorder %v692_v5, %v690_v4  ;;  %v701_v7 = vsub.s32 0, %v690_v4 }
  0x44   : > { %v695_v9 = vsel %vm694_vm1, 0.0, %v2182_v8 }
  0x45   : > { %v702_v10 = vrot.slane %v697_v6, %v701_v7 }
  0x47   : > { %v704_v11 = vadd.f32 %v702_v10, %v695_v9 }
  0x49   : > { %706 = vst.msk [vmem:[#allocation2] sm:$0xff] %vm705_vm2, %v704_v11 }
  0x4a PF: > { %v2417_v12 = vld [vmem:[%s2412_s12] sm:$0xff]  ;;  %vm723_vm3 = vcmask 261120   ;;  %v2183_v20 = vmov 0.0   ;;  %vm2184_vm4 = vmmov 0   ;;  %v2053_v21 = vld [vmem:[%s2370_s11] sm:$0xff]   ;;  %s2701_s16 = scalar_lea.vmem %s2638_s3, %s2350_s26  ;;  %s2702_s28 = scalar_lea.vmem %s2640_s5, %s2350_s26  ;;  %vm819_vm5 = vcmask 64512  }
  0x4b   : > { %v724_v13 = vsel %vm723_vm3, %v2417_v12, 0.0  ;;  %v2052_v19 = vld [vmem:[%s2370_s11 + $0x8] sm:$0xff]   ;;  %1873 = vmatprep.subr.bf16.mxu0 %v2183_v20  ;;  %1877 = vmatprep.mubr.msk.bf16.mxu0 %vm2184_vm4, %v2183_v20  ;;  %s2700_s11 = scalar_lea.vmem %s2637_s2, %s2350_s26  ;;  %v1797_v28 = vld [vmem:[%s2701_s16] ss:$0 sm:$0xff]  ;;  %s2185_s30 = smov 120   ;;  %vm884_vm6 = vcmask 1043456  }
  0x4c   : > { %725 = vadd.xlane.f32.xlu0 %v724_v13  ;;  %1874 = vmatpush3.bf16.msra.mxu0 %v2052_v19  ;;  %v1796_v26 = vld [vmem:[%s2700_s11] ss:$0 sm:$0xff]  ;;  %s2186_s24 = smov 96   ;;  %s2187_s21 = smov 88   ;;  %vm1047_vm7 = vcmask 125952   ;;  %vm1285_vm8 = vcmask 257152  }
  0x4d   : > { %1893 = vmatprep.subr.bf16.mxu1 %v2183_v20  ;;  %1875 = vmatprep.subr.bf16.mxu0 %v2183_v20  ;;  %v1798_v32 = vld [vmem:[%s2702_s28] ss:$0 sm:$0xff]  ;;  %s2188_s22 = smov 80   ;;  %s2189_s29 = smov 112  }
  0x4e   : > { %1895 = vmatprep.mubr.msk.bf16.mxu1 %vm2184_vm4, %v2183_v20  ;;  %s2190_s20 = smov 72   ;;  %s2191_s17 = smov 104  }
  0x4f   : > { %s2192_s25 = smov 64   ;;  %s2193_s13 = smov 56  }
  0x50   : > { %1876 = vmatpush3.bf16.msra.mxu0 %v2053_v21  ;;  %v815_v51 = vld [vmem:[#allocation2] sm:$0xff]  ;;  %s2194_s1 = smov 48   ;;  %s2195_s6 = smov 40  }
  0x51   : > { %1881 = vmatprep.subr.bf16.mxu0 %v2183_v20  ;;  %s2196_s11 = smov 8   ;;  %s2197_s14 = smov 16  }
  0x52   : > { %s2703_s16 = sld [smem:[#allocation24_spill]] }
  0x58   : > { %s2704_s19 = scalar_lea.vmem %s2703_s16, %s2350_s26 }
  0xd5   : > { %v726_v14 = vpop.xlane.xlu0 %725 }
  0xd6   : > { %v728_v15 = vmul.f32 0.03125, %v726_v14 }
  0xd8   : > { %v729_v16 = vsub.f32 %v2417_v12, %v728_v15 }
  0xda   : > { %v730_v17 = vmul.f32 %v729_v16, %v729_v16 }
  0xdc   : > { %v731_v18 = vsel %vm723_vm3, %v730_v17, 0.0 }
  0xdd   : > { %732 = vadd.xlane.f32.xlu0 %v731_v18 }
 0x166   : > { %v733_v22 = vpop.xlane.xlu0 %732 }
 0x167   : > { %v734_v23 = vmul.f32 0.03125, %v733_v22 }
 0x169   : > { %v735_v24 = vadd.f32 1e-05, %v734_v23 }
 0x16b   : > { %2066 = vrsqrt.f32 %v735_v24 }
 0x178   : > { %v2067_v25 = vpop.eup %2066 }
 0x179   : > { %v737_v27 = vmul.f32 %v2067_v25, %v729_v16 }
 0x17b   : > { %v744_v29 = vmul.f32 %v1796_v26, %v737_v27 }
 0x17d   : > { %v751_v30 = vadd.f32 %v1797_v28, %v744_v29 }
 0x17f   : > { %v752_v31 = vpack.c.bf16 %v751_v30, %v751_v30 }
 0x181   : > { %1878 = vmatmul.mubr.msk.bf16.vlgmr.msra.gmra.mxu0 %vm723_vm3, %v752_v31 }
 0x182   : > { %1883 = vmatprep.mubr.msk.bf16.mxu0 %vm2184_vm4, %v2183_v20 }
 0x241   : > { %v808_v33 = vpop.f32.mrf.mxu0 }
 0x242   : > { %v809_v34 = vadd.f32 %v1798_v32, %v808_v33 }
 0x243   : > { %v1879_v35 = vpop.f32.mrf.mxu0 }
 0x244   : > { %v2451_v36 = vpack.c.bf16 %v809_v34, %v809_v34 }
 0x245   : > { %v811_v37 = vpop.f32.mrf.mxu0 }
 0x246   : > { %929 = vrot.lane.b32.xlu0 %v2451_v36, %s2185_s30  ;;  %817 = vrot.lane.b32.xlu1 %v2451_v36, %s2186_s24  ;;  %s2705_s30 = sld [smem:[#allocation25_spill]] }
 0x247   : > { %v1880_v38 = vpop.f32.mrf.mxu0 }
 0x24a   : > { %931 = vrot.lane.b32.xlu1 %v2451_v36, %s2187_s21 }
 0x24c   : > { %s2706_s24 = scalar_lea.vmem %s2705_s30, %s2350_s26 }
 0x24e   : > { %1051 = vrot.lane.b32.xlu1 %v2451_v36, %s2188_s22 }
 0x252   : > { %1049 = vrot.lane.b32.xlu1 %v2451_v36, %s2189_s29 }
 0x256   : > { %1163 = vrot.lane.b32.xlu1 %v2451_v36, %s2190_s20  ;;  %s2708_s20 = sld [smem:[#allocation11_spill]] }
 0x25a   : > { %1161 = vrot.lane.b32.xlu1 %v2451_v36, %s2191_s17 }
 0x2b8   : > { %v818_v39 = vpop.permute.xlu1 %817  ;;  %v930_v44 = vpop.permute.xlu0 %929 }
 0x2b9   : > { %v824_v40 = vsel %vm819_vm5, %v818_v39, 0 }
 0x2ba   : > { %1882 = vmatpush3.bf16.xpose.msra.mxu0 %v824_v40 }
 0x2bb   : > { %1887 = vmatprep.subr.bf16.mxu0 %v2183_v20 }
 0x2bc   : > { %v932_v41 = vpop.permute.xlu1 %931 }
 0x2bd   : > { %v937_v42 = vsel %vm819_vm5, %v932_v41, 0 }
 0x2be   : > { %1894 = vmatpush3.bf16.xpose.msra.mxu1 %v937_v42 }
 0x2bf   : > { %1905 = vmatprep.subr.bf16.mxu1 %v2183_v20 }
 0x2c0   : > { %v1052_v43 = vpop.permute.xlu1 %1051 }
 0x2c1   : > { %1884 = vmatmul.mubr.msk.bf16.vlgmr.msra.gmra.mxu0 %vm819_vm5, %v2451_v36  ;;  %v1057_v46 = vsel %vm819_vm5, %v1052_v43, 0 }
 0x2c2   : > { %1889 = vmatprep.mubr.msk.bf16.mxu0 %vm2184_vm4, %v2183_v20 }
 0x2c4   : > { %v1050_v45 = vpop.permute.xlu1 %1049 }
 0x2c5   : > { %1896 = vmatmul.mubr.msk.bf16.vlgmr.msra.gmra.mxu1 %vm819_vm5, %v930_v44 }
 0x2c6   : > { %1906 = vmatpush3.bf16.xpose.msra.mxu1 %v1057_v46  ;;  %1907 = vmatprep.mubr.msk.bf16.mxu1 %vm2184_vm4, %v2183_v20 }
 0x2c7   : > { %1917 = vmatprep.subr.bf16.mxu1 %v2183_v20 }
 0x2c8   : > { %v1164_v47 = vpop.permute.xlu1 %1163 }
 0x2c9   : > { %v1169_v48 = vsel %vm819_vm5, %v1164_v47, 0 }
 0x2cc   : > { %v1162_v49 = vpop.permute.xlu1 %1161 }
 0x2cd   : > { %1908 = vmatmul.mubr.msk.bf16.vlgmr.msra.gmra.mxu1 %vm819_vm5, %v1050_v45 }
 0x2ce   : > { %1918 = vmatpush3.bf16.xpose.msra.mxu1 %v1169_v48  ;;  %1919 = vmatprep.mubr.msk.bf16.mxu1 %vm2184_vm4, %v2183_v20 }
 0x2cf   : > { %1929 = vmatprep.subr.bf16.mxu1 %v2183_v20 }
 0x2d5   : > { %1920 = vmatmul.mubr.msk.bf16.vlgmr.msra.gmra.mxu1 %vm819_vm5, %v1162_v49 }
 0x2d6   : > { %1933 = vmatprep.mubr.msk.bf16.mxu1 %vm2184_vm4, %v2183_v20 }
 0x381   : > { %v860_v50 = vpop.f32.mrf.mxu0 }
 0x382   : > { %v866_v52 = vmul.f32 0.35355338, %v860_v50 }
 0x383   : > { %v1885_v53 = vpop.f32.mrf.mxu0 }
 0x384   : > { %v867_v54 = vadd.f32 %v866_v52, %v815_v51 }
 0x385   : > { %v863_v55 = vpop.f32.mrf.mxu0  ;;  %v973_v56 = vpop.f32.mrf.mxu1 }
 0x386   : > { %v979_v57 = vmul.f32 0.35355338, %v973_v56  ;;  %v868_v58 = vsel %vm819_vm5, %v867_v54, -inf }
 0x387   : > { %v1897_v59 = vpop.f32.mrf.mxu1  ;;  %869 = vmax.xlane.f32.xlu1 %v868_v58  ;;  %v1886_v60 = vpop.f32.mrf.mxu0 }
 0x388   : > { %v980_v61 = vadd.f32 %v979_v57, %v815_v51 }
 0x389   : > { %v976_v62 = vpop.f32.mrf.mxu1 }
 0x38a   : > { %v981_v63 = vsel %vm819_vm5, %v980_v61, -inf }
 0x38b   : > { %982 = vmax.xlane.f32.xlu0 %v981_v63  ;;  %v1898_v0 = vpop.f32.mrf.mxu1 }
 0x38d   : > { %v1093_v1 = vpop.f32.mrf.mxu1 }
 0x38e   : > { %v1099_v13 = vmul.f32 0.35355338, %v1093_v1 }
 0x38f   : > { %v1909_v2 = vpop.f32.mrf.mxu1 }
 0x390   : > { %v1100_v14 = vadd.f32 %v1099_v13, %v815_v51 }
 0x391   : > { %v1096_v3 = vpop.f32.mrf.mxu1 }
 0x392   : > { %v1101_v15 = vsel %vm819_vm5, %v1100_v14, -inf }
 0x393   : > { %v1910_v4 = vpop.f32.mrf.mxu1 }
 0x395   : > { %v1205_v5 = vpop.f32.mrf.mxu1 }
 0x396   : > { %v1211_v6 = vmul.f32 0.35355338, %v1205_v5 }
 0x397   : > { %v1921_v7 = vpop.f32.mrf.mxu1 }
 0x398   : > { %879 = vrot.lane.b32.xlu1 %v2451_v36, %s2192_s25  ;;  %v1212_v8 = vadd.f32 %v1211_v6, %v815_v51 }
 0x399   : > { %v1208_v9 = vpop.f32.mrf.mxu1 }
 0x39a   : > { %v1213_v10 = vsel %vm819_vm5, %v1212_v8, -inf }
 0x39b   : > { %1214 = vmax.xlane.f32.xlu0 %v1213_v10  ;;  %v1922_v11 = vpop.f32.mrf.mxu1 }
 0x3b1   : > { %992 = vrot.lane.b32.xlu0 %v2451_v36, %s2193_s13 }
 0x3bc   : > { %1102 = vmax.xlane.f32.xlu1 %v1101_v15  ;;  %v2054_v15 = vld [vmem:[%s2379_s27 + $0x8] sm:$0xff]  }
 0x3bd   : > { %1930 = vmatpush3.bf16.msra.mxu1 %v2054_v15 }
 0x3be   : > { %1931 = vmatprep.subr.bf16.mxu1 %v2183_v20 }
 0x3cd   : > { %1112 = vrot.lane.b32.xlu1 %v2451_v36, %s2194_s1  ;;  %s1831_s1 = sshll.u32 %s2708_s20, 7 }
 0x3d1   : > { %1224 = vrot.lane.b32.xlu1 %v2451_v36, %s2195_s6  ;;  %s1581_s6 = sshll.u32 %s2412_s12, 4  ;;  %s2581_s6 = int_to_ptr.vmem [resolvable:$true] %s1581_s6 }
 0x3d2   : > { %s2088_s16 = scalar_lea.vmem %s2581_s6, 128 }
 0x3d3   : > { %p2089_p1 = scmp.ne.s32.totalorder %s2581_s6, %s2088_s16 }
 0x3d5   : > { %p2090_p2 = pnand %p2089_p1, %p2323_p3 }
 0x3d7   : > { %p2091_p4 = pneg %p2090_p2 }
 0x410   : > { %v870_v16 = vpop.xlane.xlu1 %869 }
 0x411   : > { %v871_v17 = vsub.f32 %v867_v54, %v870_v16  ;;  %v2055_v16 = vld [vmem:[%s2379_s27] sm:$0xff]   ;;  %s2712_s27 = sld [smem:[#allocation29_spill]] }
 0x412   : > { %1932 = vmatpush3.bf16.msra.mxu1 %v2055_v16 }
 0x413   : > { %v872_v18 = vmul.f32 1.442695, %v871_v17  ;;  %1945 = vmatprep.subr.bf16.mxu1 %v2183_v20 }
 0x414   : > { %v983_v19 = vpop.xlane.xlu0 %982  ;;  %v880_v21 = vpop.permute.xlu1 %879 }
 0x415   : > { %2068 = vpow2.f32 %v872_v18  ;;  %v984_v22 = vsub.f32 %v980_v61, %v983_v19  ;;  %v886_v23 = vsel %vm884_vm6, %v880_v21, 0 }
 0x416   : > { %1888 = vmatpush3.bf16.msra.mxu0 %v886_v23 }
 0x417   : > { %v985_v24 = vmul.f32 1.442695, %v984_v22  ;;  %1899 = vmatprep.subr.bf16.mxu0 %v2183_v20  ;;  %s2579_s15 = scalar_lea.hbm %s2712_s27, %s1831_s1 }
 0x419   : > { %2070 = vpow2.f32 %v985_v24 }
 0x422   : > { %v2069_v25 = vpop.eup %2068 }
 0x423   : > { %v878_v26 = vpack.c.bf16 %v2069_v25, %v2069_v25  ;;  %v874_v34 = vsel %vm819_vm5, %v2069_v25, 0.0  ;;  %v1811_v25 = vld [vmem:[%s2704_s19] ss:$0 sm:$0xff]  ;;  %s2198_s19 = smov [#allocation4]  }
 0x424   : > { %v1215_v27 = vpop.xlane.xlu0 %1214  ;;  %s2092_s23 = sshll.u32 %s2198_s19, 4  ;;  %s2093_s23 = int_to_ptr.vmem [resolvable:$false] %s2092_s23 }
 0x425   : > { %v1216_v28 = vsub.f32 %v1212_v8, %v1215_v27  ;;  %1890 = vmatmul.mubr.msk.bf16.vlgmr.msra.gmra.mxu0 %vm819_vm5, %v878_v26  ;;  %s2094_s28 = scalar_lea.vmem %s2093_s23, 256  ;;  %p2095_p5 = scmp.lt.s32.totalorder %s2581_s6, %s2093_s23 }
 0x426   : > { %v2071_v29 = vpop.eup %2070  ;;  %1901 = vmatprep.mubr.msk.bf16.mxu0 %vm2184_vm4, %v2183_v20  ;;  %p2096_p6 = scmp.lt.s32.totalorder %s2094_s28, %s2088_s16 }
 0x427   : > { %v1217_v30 = vmul.f32 1.442695, %v1216_v28  ;;  %v987_v31 = vsel %vm819_vm5, %v2071_v29, 0.0  ;;  %v991_v35 = vpack.c.bf16 %v2071_v29, %v2071_v29 }
 0x428   : > { %v993_v32 = vpop.permute.xlu0 %992  ;;  %988 = vadd.xlane.f32.xlu1 %v987_v31  ;;  %p2097_p7 = por %p2096_p6, %p2095_p5 }
 0x429   : > { %2072 = vpow2.f32 %v1217_v30  ;;  %v998_v33 = vsel %vm884_vm6, %v993_v32, 0 }
 0x42a   : > { %1900 = vmatpush3.bf16.msra.mxu0 %v998_v33  ;;  %p2098_p8 = pnand %p2097_p7, %p2091_p4 }
 0x42b   : > { %1911 = vmatprep.subr.bf16.mxu0 %v2183_v20 }
 0x42c   : > { %875 = vadd.xlane.f32.xlu1 %v874_v34 }
 0x42d   : > { %1902 = vmatmul.mubr.msk.bf16.vlgmr.msra.gmra.mxu0 %vm819_vm5, %v991_v35 }
 0x42e   : > { %1913 = vmatprep.mubr.msk.bf16.mxu0 %vm2184_vm4, %v2183_v20 }
 0x436   : > { %v2073_v36 = vpop.eup %2072 }
 0x437   : > { %v1219_v37 = vsel %vm819_vm5, %v2073_v36, 0.0  ;;  %v1223_v48 = vpack.c.bf16 %v2073_v36, %v2073_v36 }
 0x438   : > { %1220 = vadd.xlane.f32.xlu0 %v1219_v37 }
 0x445   : > { %v1103_v38 = vpop.xlane.xlu1 %1102 }
 0x446   : > { %v1104_v39 = vsub.f32 %v1100_v14, %v1103_v38  ;;  %v2056_v38 = vld [vmem:[%s2396_s18 + $0x8] sm:$0xff]  }
 0x448   : > { %v1105_v40 = vmul.f32 1.442695, %v1104_v39 }
 0x449   : > { %v1113_v41 = vpop.permute.xlu1 %1112 }
 0x44a   : > { %2074 = vpow2.f32 %v1105_v40  ;;  %v1118_v42 = vsel %vm884_vm6, %v1113_v41, 0 }
 0x44b   : > { %1912 = vmatpush3.bf16.msra.mxu0 %v1118_v42 }
 0x44c   : > { %1923 = vmatprep.subr.bf16.mxu0 %v2183_v20 }
 0x44d   : > { %v1225_v44 = vpop.permute.xlu1 %1224 }
 0x44e   : > { %v1230_v47 = vsel %vm884_vm6, %v1225_v44, 0 }
 0x457   : > { %v2075_v43 = vpop.eup %2074 }
 0x458   : > { %v1107_v45 = vsel %vm819_vm5, %v2075_v43, 0.0  ;;  %v1111_v46 = vpack.c.bf16 %v2075_v43, %v2075_v43  ;;  %v1815_v43 = vld [vmem:[%s2706_s24] ss:$0 sm:$0xff] }
 0x459   : > { %1108 = vadd.xlane.f32.xlu0 %v1107_v45  ;;  %v1816_v45 = vld [vmem:[%s664_s0] ss:$0 sm:$0xff] }
 0x45a   : > { %1914 = vmatmul.mubr.msk.bf16.vlgmr.msra.gmra.mxu0 %vm819_vm5, %v1111_v46 }
 0x45b   : > { %1924 = vmatpush3.bf16.msra.mxu0 %v1230_v47  ;;  %1925 = vmatprep.mubr.msk.bf16.mxu0 %vm2184_vm4, %v2183_v20 }
 0x45c   : > { %1937 = vmatprep.subr.bf16.mxu0 %v2183_v20 }
 0x462   : > { %1926 = vmatmul.mubr.msk.bf16.vlgmr.msra.gmra.mxu0 %vm819_vm5, %v1223_v48 }
 0x463   : > { %1941 = vmatprep.mubr.msk.bf16.mxu0 %vm2184_vm4, %v2183_v20  ;;  %1938 = vmatpush3.bf16.msra.mxu0 %v2056_v38 }
 0x464   : > { %1939 = vmatprep.subr.bf16.mxu0 %v2183_v20 }
 0x4b1   : > { %v989_v49 = vpop.xlane.xlu1 %988 }
 0x4b2   : > { %2076 = vrcp.f32 %v989_v49  ;;  %v2058_v49 = vld [vmem:[%s2410_s8 + $0x38] sm:$0xff]  }
 0x4b5   : > { %v876_v7 = vpop.xlane.xlu1 %875 }
 0x4bf   : > { %v2077_v54 = vpop.eup %2076 }
 0x4c1   : > { %v1221_v60 = vpop.xlane.xlu0 %1220 }
 0x4c2   : > { %2078 = vrcp.f32 %v1221_v60 }
 0x4c3   : > { %2080 = vrcp.f32 %v876_v7 }
 0x4cf   : > { %v2079_v1 = vpop.eup %2078 }
 0x4d0   : > { %v2081_v8 = vpop.eup %2080 }
 0x4e2   : > { %v1109_v14 = vpop.xlane.xlu0 %1108 }
 0x4e3   : > { %2082 = vrcp.f32 %v1109_v14 }
 0x4e5   : > { %v922_v50 = vpop.f32.mrf.mxu0 }
 0x4e6   : > { %v928_v9 = vmul.f32 %v2081_v8, %v922_v50  ;;  %v2059_v50 = vld [vmem:[%s2410_s8 + $0x30] sm:$0xff]   ;;  %v1817_v8 = vld [vmem:[%s680_s7] ss:$0 sm:$0xff] }
 0x4e7   : > { %v1891_v51 = vpop.f32.mrf.mxu0 }
 0x4e8   : > { %v2060_v51 = vld [vmem:[%s2410_s8 + $0x28] sm:$0xff]  }
 0x4e9   : > { %v925_v52 = vpop.f32.mrf.mxu0 }
 0x4ea   : > { %v2061_v52 = vld [vmem:[%s2410_s8 + $0x20] sm:$0xff]  }
 0x4eb   : > { %v1892_v53 = vpop.f32.mrf.mxu0 }
 0x4ec   : > { %v2062_v53 = vld [vmem:[%s2410_s8 + $0x18] sm:$0xff]  }
 0x4ed   : > { %v1034_v55 = vpop.f32.mrf.mxu0 }
 0x4ee   : > { %v1040_v56 = vmul.f32 %v2077_v54, %v1034_v55  ;;  %v2063_v54 = vld [vmem:[%s2410_s8 + $0x10] sm:$0xff]   ;;  %v2064_v55 = vld [vmem:[%s2410_s8 + $0x8] sm:$0xff]  }
 0x4ef   : > { %v1903_v57 = vpop.f32.mrf.mxu0 }
 0x4f0   : > { %1042 = vrot.lane.b32.xlu1 %v1040_v56, %s2196_s11  ;;  %v2083_v17 = vpop.eup %2082  ;;  %v2065_v56 = vld [vmem:[%s2410_s8] sm:$0xff]   ;;  %s2709_s8 = sld [smem:[#allocation8_spill]] }
 0x4f1   : > { %v1037_v58 = vpop.f32.mrf.mxu0  ;;  %v1818_v57 = vld [vmem:[%s672_s4] ss:$0 sm:$0xff] }
 0x4f3   : > { %v1904_v59 = vpop.f32.mrf.mxu0 }
 0x4f6   : > { %s2713_s7 = sand.u32 1, %s2709_s8  }
 0x4f7   : > { %s1568_s26 = scalar_lea.sflag [#allocation5], %s2713_s7 }
 0x51a   : > { %v1154_v61 = vpop.f32.mrf.mxu0 }
 0x51b   : > { %v1160_v18 = vmul.f32 %v2083_v17, %v1154_v61 }
 0x51c   : > { %v1915_v62 = vpop.f32.mrf.mxu0 }
 0x51e   : > { %v1157_v63 = vpop.f32.mrf.mxu0 }
 0x520   : > { %v1916_v0 = vpop.f32.mrf.mxu0 }
 0x522   : > { %v1266_v2 = vpop.f32.mrf.mxu0 }
 0x523   : > { %v1272_v3 = vmul.f32 %v2079_v1, %v1266_v2 }
 0x524   : > { %v1927_v4 = vpop.f32.mrf.mxu0 }
 0x525   : > { %1274 = vrot.lane.b32.xlu0 %v1272_v3, %s2196_s11 }
 0x526   : > { %v1269_v5 = vpop.f32.mrf.mxu0 }
 0x528   : > { %v1928_v6 = vpop.f32.mrf.mxu0 }
 0x562   : > { %v1043_v10 = vpop.permute.xlu1 %1042 }
 0x563   : > { %v1045_v11 = vsel %vm819_vm5, %v928_v9, %v1043_v10 }
 0x564   : > { %v1046_v13 = vpack.c.bf16 %v1045_v11, %v1045_v11 }
 0x566   : > { %1048 = vst.msk [vmem:[#allocation3] sm:$0xf] %vm1047_vm7, %v1046_v13 }
 0x597   : > { %v1275_v19 = vpop.permute.xlu0 %1274 }
 0x598   : > { %v1277_v21 = vsel %vm819_vm5, %v1160_v18, %v1275_v19 }
 0x599   : > { %v1838_v22 = vpack.c.bf16 %v1277_v21, %v1277_v21 }
 0x59b   : > { %1282 = vrot.lane.b32.xlu0 %v1838_v22, %s2197_s14 }
 0x60d   : > { %v1283_v23 = vpop.permute.xlu0 %1282 }
 0x60e   : > { %1286 = vst.msk [vmem:[#allocation3] sm:$0xf] %vm1285_vm8, %v1283_v23 }
 0x615   : > { %v1287_v24 = vld [vmem:[#allocation3] sm:$0xf] }
 0x616   : > { %1934 = vmatmul.mubr.msk.bf16.vlgmr.msra.gmra.mxu1 %vm723_vm3, %v1287_v24 }
 0x617   : > { %1961 = vmatprep.mubr.msk.bf16.mxu1 %vm2184_vm4, %v2183_v20  ;;  %1946 = vmatpush3.bf16.msra.mxu1 %v2058_v49 }
 0x618   : > { %1947 = vmatprep.subr.bf16.mxu1 %v2183_v20 }
 0x61b   : > { %1948 = vmatpush3.bf16.msra.mxu1 %v2059_v50 }
 0x61c   : > { %1949 = vmatprep.subr.bf16.mxu1 %v2183_v20 }
 0x61f   : > { %1950 = vmatpush3.bf16.msra.mxu1 %v2060_v51 }
 0x620   : > { %1951 = vmatprep.subr.bf16.mxu1 %v2183_v20 }
 0x623   : > { %1952 = vmatpush3.bf16.msra.mxu1 %v2061_v52 }
 0x624   : > { %1953 = vmatprep.subr.bf16.mxu1 %v2183_v20 }
 0x627   : > { %1954 = vmatpush3.bf16.msra.mxu1 %v2062_v53 }
 0x628   : > { %1955 = vmatprep.subr.bf16.mxu1 %v2183_v20 }
 0x62b   : > { %1956 = vmatpush3.bf16.msra.mxu1 %v2063_v54 }
 0x62c   : > { %1957 = vmatprep.subr.bf16.mxu1 %v2183_v20 }
 0x62f   : > { %1958 = vmatpush3.bf16.msra.mxu1 %v2064_v55 }
 0x630   : > { %1959 = vmatprep.subr.bf16.mxu1 %v2183_v20 }
 0x633   : > { %1960 = vmatpush3.bf16.msra.mxu1 %v2065_v56 }
 0x6d6   : > { %v1343_v26 = vpop.f32.mrf.mxu1 }
 0x6d7   : > { %v1344_v27 = vadd.f32 %v1811_v25, %v1343_v26 }
 0x6d8   : > { %v1935_v28 = vpop.f32.mrf.mxu1 }
 0x6d9   : > { %v2528_v29 = vadd.f32 %v1344_v27, %v2417_v12  ;;  %v2057_v12 = vld [vmem:[%s2396_s18] sm:$0xff]  }
 0x6da   : > { %v1346_v30 = vpop.f32.mrf.mxu1  ;;  %1940 = vmatpush3.bf16.msra.mxu0 %v2057_v12 }
 0x6db   : > { %v1350_v31 = vsel %vm723_vm3, %v2528_v29, 0.0  ;;  %v1384_v9 = vadd.f32 %v1817_v8, %v2528_v29 }
 0x6dc   : > { %1351 = vadd.xlane.f32.xlu1 %v1350_v31  ;;  %v1936_v32 = vpop.f32.mrf.mxu1 }
 0x765   : > { %v1352_v33 = vpop.xlane.xlu1 %1351 }
 0x766   : > { %v1353_v34 = vmul.f32 0.03125, %v1352_v33 }
 0x768   : > { %v1354_v35 = vsub.f32 %v2528_v29, %v1353_v34 }
 0x76a   : > { %v1355_v36 = vmul.f32 %v1354_v35, %v1354_v35 }
 0x76c   : > { %v1356_v37 = vsel %vm723_vm3, %v1355_v36, 0.0 }
 0x76d   : > { %1357 = vadd.xlane.f32.xlu0 %v1356_v37 }
 0x7f6   : > { %v1358_v39 = vpop.xlane.xlu0 %1357 }
 0x7f7   : > { %v1359_v40 = vmul.f32 0.03125, %v1358_v39 }
 0x7f9   : > { %v1360_v41 = vadd.f32 1e-05, %v1359_v40 }
 0x7fb   : > { %2084 = vrsqrt.f32 %v1360_v41 }
 0x808   : > { %v2085_v42 = vpop.eup %2084 }
 0x809   : > { %v1362_v44 = vmul.f32 %v2085_v42, %v1354_v35 }
 0x80b   : > { %v1369_v46 = vmul.f32 %v1815_v43, %v1362_v44 }
 0x80d   : > { %v1376_v47 = vadd.f32 %v1816_v45, %v1369_v46 }
 0x80f   : > { %v1377_v48 = vpack.c.bf16 %v1376_v47, %v1376_v47 }
 0x811   : > { %1942 = vmatmul.mubr.msk.bf16.vlgmr.msra.gmra.mxu0 %vm723_vm3, %v1377_v48 }
 0x8d1   : > { %v1461_v58 = vpop.f32.mrf.mxu0 }
 0x8d2   : > { %v1462_v59 = vadd.f32 %v1818_v57, %v1461_v58 }
 0x8d3   : > { %v1943_v60 = vpop.f32.mrf.mxu0 }
 0x8d4   : > { %v1468_v61 = vmul.f32 0.044715, %v1462_v59  ;;  %v1467_v4 = vmul.f32 0.5, %v1462_v59 }
 0x8d5   : > { %v1464_v62 = vpop.f32.mrf.mxu0 }
 0x8d6   : > { %v1469_v63 = vmul.f32 %v1468_v61, %v1462_v59 }
 0x8d7   : > { %v1944_v0 = vpop.f32.mrf.mxu0 }
 0x8d8   : > { %v1470_v1 = vmul.f32 %v1469_v63, %v1462_v59 }
 0x8da   : > { %v1471_v2 = vadd.f32 %v1470_v1, %v1462_v59 }
 0x8dc   : > { %v1472_v3 = vmul.f32 0.7978846, %v1471_v2 }
 0x8de   : > { %2086 = vtanh.f32 %v1472_v3 }
 0x8eb   : > { %v2087_v20 = vpop.eup %2086 }
 0x8ec   : > { %v1474_v5 = vadd.f32 1.0, %v2087_v20 }
 0x8ee   : > { %v1475_v6 = vmul.f32 %v1474_v5, %v1467_v4 }
 0x8f0   : > { %v1476_v7 = vpack.c.bf16 %v1475_v6, %v1475_v6 }
 0x8f2   : > { %1962 = vmatmul.mubr.bf16.vlgmr.msra.gmra.mxu1 %v1476_v7 }
 0x9b2   : > { %v1559_v10 = vpop.f32.mrf.mxu1 }
 0x9b3   : > { %v1565_v11 = vadd.f32 %v1559_v10, %v1384_v9 }
 0x9b4   : > { %v1963_v13 = vpop.f32.mrf.mxu1 }
 0x9b5   : > { %1566 = vst.msk [vmem:[%s2412_s12] sm:$0xff] %vm723_vm3, %v1565_v11 }
 0x9b6   : > { %v1562_v14 = vpop.f32.mrf.mxu1 }
 0x9b7   : > { %2101 = shalt.err (!%p2098_p8)
}
 0x9b8   : > { %s2102_s12 = scalar_lea.hbm %s2579_s15, 128  ;;  %s2106_s21 = scalar_lea.hbm %s2712_s27, 256 }
 0x9b9   : > { %p2103_p10 = scmp.ne.s32.totalorder %s2579_s15, %s2102_s12  ;;  %p2107_p13 = scmp.lt.s32.totalorder %s2579_s15, %s2712_s27 }
 0x9ba   : > { %p2108_p0 = scmp.lt.s32.totalorder %s2106_s21, %s2102_s12 }
 0x9bb   : > { %p2104_p11 = pnand %p2103_p10, %p2323_p3 }
 0x9bc   : > { %p2109_p1 = por %p2108_p0, %p2107_p13 }
 0x9bd   : > { %p2105_p12 = pneg %p2104_p11 }
 0x9bf   : > { %p2110_p2 = pnand %p2109_p1, %p2105_p12 }
 0x9c1   : > { %2113 = shalt.err (!%p2110_p2)
}
 0x9c2   : > { %1965 = dma.vmem_to_hbm [thread:$0]  (%p2323_p3), %s2581_s6, 128, %s2579_s15, %s1568_s26   ;;  %v1964_v15 = vpop.f32.mrf.mxu1 }
 0x9c3 PF: > { %s2714_s18 = sld [smem:[#allocation14_spill]] }
 0x9c4   : > { %s2715_s29 = sld [smem:[#allocation7_spill]] }
 0x9c9   : > { %p1971_p4 = scmp.ge.s32.totalorder %s2714_s18, 2 }
 0x9ca   : > { %s1593_s8 = sand.u32 1, %s2715_s29  }
 0x9cb   : > { %p1968_p5 = pnand %p1971_p4, %p2333_p9  ;;  %s1594_s17 = scalar_lea.sflag [#allocation5], %s1593_s8 }
 0x9cd   : > { %p1969_p6 = pneg %p1968_p5 }
 0x9cf   : > { %2147 = dma.done.wait (%p1969_p6), %s1594_s17, 128  }
 0x9d0   : > { %2149 = vsyncadd (%p1969_p6), %s1594_s17, 4294967168  ;;  %s27_s20 = sadd.s32 1, %s2714_s18   ;;  %s2717_s29 = sld [smem:[#allocation8_spill]] }
 0x9d1   : > { %p24_p7 = scmp.ge.s32.totalorder %s27_s20, 6   ;;  %s2718_s30 = sld [smem:[#allocation9_spill]] }
 0x9d2   : > { %s2719_s15 = sld [smem:[#allocation19_spill]] }
 0x9d3   : > { %s2720_s16 = sld [smem:[#allocation12_spill]]  ;;  %26 = sbr.rel (!%p24_p7) target bundleno = 16 (0x10), region = 154 }
 0x9d4   : > { %s2721_s17 = sld [smem:[#allocation13_spill]] }
 0x9d5   : > { %s2722_s18 = sld [smem:[#allocation15_spill]] }
 0x9d6   : > { %s2723_s19 = sld [smem:[#allocation17_spill]] }
 0x9d8   :  { %1599 = vsyncpa [#allocation5], 1 }
 0x9d9   :  { %1601 = vsyncpa [#allocation5 + $0x1], 1 }

</bundles_post_ra>
